<compile_context>
chip_gen: v6e
topology: v6e:2x2x1
jax: 0.10.0
libtpu: 0.0.40
codegen_flags: <defaults>
</compile_context>

<pallas_src>
import functools

import numpy as np
import jax
import jax.numpy as jnp
from jax import lax
from jax.experimental import pallas as pl
from jax.experimental.pallas import tpu as pltpu


# ---------------- sincos positional embedding (host-side, numpy) -----------
def get_1d_sincos_pos_embed_from_grid(embed_dim, pos):
    assert embed_dim % 2 == 0
    omega = np.arange(embed_dim // 2, dtype=np.float32)
    omega /= embed_dim / 2.0
    omega = 1.0 / 10000 ** omega
    pos = pos.reshape(-1)
    out = np.einsum("m,d->md", pos, omega)
    return np.concatenate([np.sin(out), np.cos(out)], axis=1)


def get_2d_sincos_pos_embed(embed_dim, grid_size, cls_token=False):
    assert embed_dim % 2 == 0
    grid_h = np.arange(grid_size, dtype=np.float32)
    grid_w = np.arange(grid_size, dtype=np.float32)
    grid = np.meshgrid(grid_w, grid_h)
    grid = np.stack(grid, axis=0).reshape([2, 1, grid_size, grid_size])
    emb_h = get_1d_sincos_pos_embed_from_grid(embed_dim // 2, grid[0])
    emb_w = get_1d_sincos_pos_embed_from_grid(embed_dim // 2, grid[1])
    pos_embed = np.concatenate([emb_h, emb_w], axis=1)
    if cls_token:
        pos_embed = np.concatenate([np.zeros([1, embed_dim]), pos_embed], axis=0)
    return pos_embed


# ---------------- in-kernel helpers -----------------------------------------
def _layernorm(x, w, b, eps=1e-5):
    mu = jnp.mean(x, axis=-1, keepdims=True)
    var = jnp.mean(jnp.square(x - mu), axis=-1, keepdims=True)
    return (x - mu) * lax.rsqrt(var + eps) * w + b


def _erf_poly(x):
    # Abramowitz & Stegun 7.1.26, |err| <= 1.5e-7 (effectively f32-exact).
    p = 0.3275911
    a1, a2, a3, a4, a5 = (0.254829592, -0.284496736, 1.421413741,
                          -1.453152027, 1.061405429)
    ax = jnp.abs(x)
    t = 1.0 / (1.0 + p * ax)
    poly = ((((a5 * t + a4) * t + a3) * t + a2) * t + a1) * t
    erf_abs = 1.0 - poly * jnp.exp(-ax * ax)
    return jnp.where(x >= 0, erf_abs, -erf_abs)


def _gelu_exact(x):
    # nn.GELU() default = exact (erf) formulation.
    return 0.5 * x * (1.0 + _erf_poly(x * (1.0 / np.sqrt(2.0))))


# ---------------- Pallas kernel ---------------------------------------------
def _mae_decoder_kernel(xsrc_ref, g_ref, pos_ref, bias_ref,
                        ln1_w_ref, ln1_b_ref, qkv_w_ref, qkv_b_ref,
                        proj_w_ref, proj_b_ref,
                        ln2_w_ref, ln2_b_ref, fc1_w_ref, fc1_b_ref,
                        fc2_w_ref, fc2_b_ref,
                        lnf_w_ref, lnf_b_ref, pred_w_ref, pred_b_ref,
                        o_ref, *, num_heads, scale):
    C = pos_ref.shape[-1]
    hd = C // num_heads

    # ---- token unshuffle + pos embed: ONE block-diagonal gather matmul -----
    # (one-hot selection is exact in bf16; accumulation is f32)
    x = jnp.dot(g_ref[...], xsrc_ref[...],
                preferred_element_type=jnp.float32) + pos_ref[...]

    # ---- Block part 1: x = x + Attn(LN1(x)) ---------------------------------
    h = _layernorm(x, ln1_w_ref[...], ln1_b_ref[...])
    qkv = jnp.dot(h.astype(jnp.bfloat16), qkv_w_ref[...],
                  preferred_element_type=jnp.float32) + qkv_b_ref[...]
    q, k, v = qkv[:, :C], qkv[:, C:2 * C], qkv[:, 2 * C:]
    bias = bias_ref[...]                     # block-diagonal + key-valid mask

    def attn_head(qi, ki, vi):
        s = lax.dot_general(qi.astype(jnp.bfloat16), ki.astype(jnp.bfloat16),
                            (((1,), (1,)), ((), ())),
                            preferred_element_type=jnp.float32)
        s = s * scale + bias
        s = s - jnp.max(s, axis=-1, keepdims=True)
        p = jnp.exp(s)
        p = p * pl.reciprocal(jnp.sum(p, axis=-1, keepdims=True), approx=True)
        return jnp.dot(p.astype(jnp.bfloat16), vi.astype(jnp.bfloat16),
                       preferred_element_type=jnp.float32)

    if num_heads == 1:
        y = attn_head(q, k, v)               # whole batch slab in one shot
    else:
        y = jnp.concatenate(
            [attn_head(q[:, i * hd:(i + 1) * hd],
                       k[:, i * hd:(i + 1) * hd],
                       v[:, i * hd:(i + 1) * hd]) for i in range(num_heads)],
            axis=-1)

    y = jnp.dot(y.astype(jnp.bfloat16), proj_w_ref[...],
                preferred_element_type=jnp.float32) + proj_b_ref[...]
    x = x + y

    # ---- Block part 2: x = x + MLP(LN2(x)) ----------------------------------
    h = _layernorm(x, ln2_w_ref[...], ln2_b_ref[...])
    h = jnp.dot(h.astype(jnp.bfloat16), fc1_w_ref[...],
                preferred_element_type=jnp.float32) + fc1_b_ref[...]
    h = _gelu_exact(h)
    h = jnp.dot(h.astype(jnp.bfloat16), fc2_w_ref[...],
                preferred_element_type=jnp.float32) + fc2_b_ref[...]
    x = x + h

    # ---- decoder_norm + decoder_pred ----------------------------------------
    x = _layernorm(x, lnf_w_ref[...], lnf_b_ref[...])
    x = jnp.dot(x.astype(jnp.bfloat16), pred_w_ref[...],
                preferred_element_type=jnp.float32) + pred_b_ref[...]
    o_ref[...] = x.astype(o_ref.dtype)


# ---------------- wrapper ----------------------------------------------------
def mae_decoder_pallas(x, ids_restore, params, *, num_heads=1):
    B, L, C = x.shape                    # L = len_keep + 1 (includes cls)
    Lk = L - 1                           # visible tokens (excl. cls)
    Np = ids_restore.shape[1]            # num_patches
    N = Np + 1                           # seq len with cls
    Npad = ((N + 15) // 16) * 16         # 16-row alignment for bf16 tiles
    M = B * Npad
    hd = C // num_heads
    scale = float(hd ** -0.5)
    hidden = params["fc1_w"].shape[1]
    assert C % 128 == 0 and hidden % 128 == 0, \
        "decoder dim and mlp hidden must be lane-aligned (multiple of 128)"

    # Flattened per-batch source slab: [cls, visible tokens..., mask_token]
    mask_row = jnp.broadcast_to(params["mask_token"].reshape(1, 1, C), (B, 1, C))
    x_src = jnp.concatenate([x, mask_row], axis=1).reshape(B * (L + 1), C)
    x_src = x_src.astype(jnp.bfloat16)

    # Block-diagonal one-hot gather matrix G_bd: (B*Npad, B*(L+1)).
    # Row b*Npad+0 -> cls of batch b, rows 1..Np -> unshuffled token (visible
    # or mask slot), pad rows -> all-zero.
    ids = ids_restore.astype(jnp.int32)                           # (B, Np)
    src_col = jnp.where(ids < Lk, ids + 1, L)                     # within-batch col
    col = jnp.concatenate(
        [jnp.zeros((B, 1), jnp.int32), src_col,
         jnp.full((B, Npad - N), -1, jnp.int32)], axis=1)         # (B, Npad)
    col = jnp.where(
        col >= 0,
        col + (jnp.arange(B, dtype=jnp.int32) * (L + 1))[:, None], -1)
    col = col.reshape(M)
    G = (col[:, None] == jnp.arange(B * (L + 1), dtype=jnp.int32)[None, :]
         ).astype(jnp.bfloat16)                                   # (M, B*(L+1))

    # Positional embedding tiled to the full slab (M, C); zero on pad rows.
    pos = params["pos_embed"].reshape(N, C)
    pos_pad = jnp.concatenate([pos, jnp.zeros((Npad - N, C), jnp.float32)], axis=0)
    pos_tiled = jnp.tile(pos_pad, (B, 1))                         # (M, C)

    # Host-precomputed additive attention bias: -1e30 for cross-batch blocks
    # and for padded key columns; 0 elsewhere. Query-pad rows keep valid keys
    # (no all -inf rows -> no NaN); they are dropped after the call.
    row_b = jnp.arange(M, dtype=jnp.int32) // Npad
    col_i = jnp.arange(M, dtype=jnp.int32) % Npad
    same_block = row_b[:, None] == row_b[None, :]
    valid_key = (col_i < N)[None, :]
    attn_bias = jnp.where(same_block & valid_key, 0.0, -1e30).astype(jnp.float32)

    # Weights: bf16 for MXU inputs, f32 for biases / LayerNorm params.
    weights = [
        params["ln1_w"], params["ln1_b"],
        params["qkv_w"].astype(jnp.bfloat16), params["qkv_b"],
        params["proj_w"].astype(jnp.bfloat16), params["proj_b"],
        params["ln2_w"], params["ln2_b"],
        params["fc1_w"].astype(jnp.bfloat16), params["fc1_b"],
        params["fc2_w"].astype(jnp.bfloat16), params["fc2_b"],
        params["lnf_w"], params["lnf_b"],
        params["pred_w"].astype(jnp.bfloat16), params["pred_b"],
    ]
    args = (x_src, G, pos_tiled, attn_bias, *weights)

    # Advisory cost estimate so XLA overlaps this tiny latency-bound kernel.
    flops = (2 * M * (B * (L + 1)) * C            # gather
             + 2 * M * C * (3 * C)                # qkv
             + num_heads * 2 * (2 * M * M * hd)   # scores + AV
             + 2 * M * C * C                      # proj
             + 2 * M * C * hidden + 2 * M * hidden * C  # mlp
             + 2 * M * C * C)                     # pred
    transcendentals = num_heads * M * M + M * hidden + 4 * M
    bytes_accessed = sum(int(np.prod(a.shape)) * a.dtype.itemsize for a in args)
    bytes_accessed += M * C * 4                   # output

    kernel = functools.partial(_mae_decoder_kernel,
                               num_heads=num_heads, scale=scale)
    vmem_spec = pl.BlockSpec(memory_space=pltpu.MemorySpace.VMEM)
    out = pl.pallas_call(
        kernel,
        out_shape=jax.ShapeDtypeStruct((M, C), jnp.float32),
        in_specs=[vmem_spec] * len(args),
        out_specs=vmem_spec,
        cost_estimate=pl.CostEstimate(flops=int(flops),
                                      transcendentals=int(transcendentals),
                                      bytes_accessed=int(bytes_accessed)),
    )(*args)

    # Drop cls token and padded rows.
    return out.reshape(B, Npad, C)[:, 1:N, :]


# ---------------- deterministic parameter init -------------------------------
def init_params(key, C, num_patches, mlp_ratio=1.0):
    hidden = int(C * mlp_ratio)
    keys = jax.random.split(key, 6)

    def xavier(k, fan_in, fan_out):
        bound = float(np.sqrt(6.0 / (fan_in + fan_out)))
        # stored as (in, out) = transpose of PyTorch's (out, in) weight
        return jax.random.uniform(k, (fan_in, fan_out), jnp.float32,
                                  -bound, bound)

    grid_size = int(round(num_patches ** 0.5))
    pos = get_2d_sincos_pos_embed(C, grid_size, cls_token=True)   # (N, C)
    params = {
        "mask_token": 0.02 * jax.random.normal(keys[0], (1, 1, C), jnp.float32),
        "pos_embed": jnp.asarray(pos, jnp.float32)[None],         # (1, N, C)
        "ln1_w": jnp.ones((1, C), jnp.float32),
        "ln1_b": jnp.zeros((1, C), jnp.float32),
        "qkv_w": xavier(keys[1], C, 3 * C),
        "qkv_b": jnp.zeros((1, 3 * C), jnp.float32),
        "proj_w": xavier(keys[2], C, C),
        "proj_b": jnp.zeros((1, C), jnp.float32),
        "ln2_w": jnp.ones((1, C), jnp.float32),
        "ln2_b": jnp.zeros((1, C), jnp.float32),
        "fc1_w": xavier(keys[3], C, hidden),
        "fc1_b": jnp.zeros((1, hidden), jnp.float32),
        "fc2_w": xavier(keys[4], hidden, C),
        "fc2_b": jnp.zeros((1, C), jnp.float32),
        "lnf_w": jnp.ones((1, C), jnp.float32),
        "lnf_b": jnp.zeros((1, C), jnp.float32),
        "pred_w": xavier(keys[5], C, C),
        "pred_b": jnp.zeros((1, C), jnp.float32),
    }
    return params


# ---------------- pure-JAX f32 reference (sanity check) ----------------------
def mae_decoder_reference(x, ids_restore, params, *, num_heads=1):
    B, Lk, C = x.shape
    Np = ids_restore.shape[1]
    N = Np + 1
    hd = C // num_heads
    scale = hd ** (-0.5)

    mask_tokens = jnp.broadcast_to(params["mask_token"], (B, N - Lk, C))
    x_ = jnp.concatenate([x[:, 1:, :], mask_tokens], axis=1)
    idx = jnp.broadcast_to(ids_restore[:, :, None].astype(jnp.int32), (B, Np, C))
    x_ = jnp.take_along_axis(x_, idx, axis=1)
    t = jnp.concatenate([x[:, :1, :], x_], axis=1) + params["pos_embed"]

    def ln(z, w, b):
        mu = jnp.mean(z, -1, keepdims=True)
        var = jnp.mean(jnp.square(z - mu), -1, keepdims=True)
        return (z - mu) / jnp.sqrt(var + 1e-5) * w + b

    h = ln(t, params["ln1_w"], params["ln1_b"])
    qkv = h @ params["qkv_w"] + params["qkv_b"]
    qkv = qkv.reshape(B, N, 3, num_heads, hd).transpose(2, 0, 3, 1, 4)
    q, k, v = qkv[0], qkv[1], qkv[2]
    attn = jnp.einsum("bhnd,bhmd->bhnm", q, k) * scale
    attn = jax.nn.softmax(attn, axis=-1)
    y = jnp.einsum("bhnm,bhmd->bhnd", attn, v)
    y = y.transpose(0, 2, 1, 3).reshape(B, N, C)
    y = y @ params["proj_w"] + params["proj_b"]
    t = t + y
    h = ln(t, params["ln2_w"], params["ln2_b"])
    h = h @ params["fc1_w"] + params["fc1_b"]
    h = jax.nn.gelu(h, approximate=False)
    h = h @ params["fc2_w"] + params["fc2_b"]
    t = t + h
    t = ln(t, params["lnf_w"], params["lnf_b"])
    t = t @ params["pred_w"] + params["pred_b"]
    return t[:, 1:, :]


# ---------------- main --------------------------------------------------------
if __name__ == "__main__":
    key = jax.random.PRNGKey(0)
    B = 2
    C = 128                                   # decoder_embed_dim (small)
    img_size, patch_size = 64, 16
    num_patches = (img_size // patch_size) ** 2   # 16 -> seq len N = 17
    len_keep = 8                                  # visible tokens (excl. cls)
    num_heads = 1                                 # decoder_num_heads default
    # decoder_depth = 1 (module default): single fused block in the kernel.

    k_p, k_x, k_id = jax.random.split(key, 3)
    params = init_params(k_p, C, num_patches, mlp_ratio=1.0)
    x = 0.5 * jax.random.normal(k_x, (B, len_keep + 1, C), jnp.float32)
    ids_restore = jax.vmap(
        lambda k: jax.random.permutation(k, num_patches)
    )(jax.random.split(k_id, B)).astype(jnp.int32)

    out = mae_decoder_pallas(x, ids_restore, params, num_heads=num_heads)
    out = jax.block_until_ready(out)

    ref = mae_decoder_reference(x, ids_restore, params, num_heads=num_heads)
    np.testing.assert_allclose(np.asarray(out), np.asarray(ref),
                               rtol=5e-2, atol=5e-2)
    print("KERNEL_OK")
</pallas_src>

<mosaic_0001>
module attributes {stable_mosaic.version = 11 : i64} {
  func.func @_mae_decoder_kernel(%arg0: memref<20x128xbf16, #tpu.memory_space<vmem>>, %arg1: memref<64x20xbf16, #tpu.memory_space<vmem>>, %arg2: memref<64x128xf32, #tpu.memory_space<vmem>>, %arg3: memref<64x64xf32, #tpu.memory_space<vmem>>, %arg4: memref<1x128xf32, #tpu.memory_space<vmem>>, %arg5: memref<1x128xf32, #tpu.memory_space<vmem>>, %arg6: memref<128x384xbf16, #tpu.memory_space<vmem>>, %arg7: memref<1x384xf32, #tpu.memory_space<vmem>>, %arg8: memref<128x128xbf16, #tpu.memory_space<vmem>>, %arg9: memref<1x128xf32, #tpu.memory_space<vmem>>, %arg10: memref<1x128xf32, #tpu.memory_space<vmem>>, %arg11: memref<1x128xf32, #tpu.memory_space<vmem>>, %arg12: memref<128x128xbf16, #tpu.memory_space<vmem>>, %arg13: memref<1x128xf32, #tpu.memory_space<vmem>>, %arg14: memref<128x128xbf16, #tpu.memory_space<vmem>>, %arg15: memref<1x128xf32, #tpu.memory_space<vmem>>, %arg16: memref<1x128xf32, #tpu.memory_space<vmem>>, %arg17: memref<1x128xf32, #tpu.memory_space<vmem>>, %arg18: memref<128x128xbf16, #tpu.memory_space<vmem>>, %arg19: memref<1x128xf32, #tpu.memory_space<vmem>>, %arg20: memref<64x128xf32, #tpu.memory_space<vmem>>) attributes {dimension_semantics = [], scalar_prefetch = 0 : i64, scratch_operands = 0 : i64, tpu.core_type = #tpu.core_type<tc>} {
    %c0 = arith.constant 0 : index
    %c0_0 = arith.constant 0 : index
    %0 = vector.load %arg1[%c0, %c0_0] : memref<64x20xbf16, #tpu.memory_space<vmem>>, vector<64x20xbf16>
    %c0_1 = arith.constant 0 : index
    %c0_2 = arith.constant 0 : index
    %1 = vector.load %arg0[%c0_1, %c0_2] : memref<20x128xbf16, #tpu.memory_space<vmem>>, vector<20x128xbf16>
    %cst = arith.constant dense<0.000000e+00> : vector<64x128xf32>
    %2 = tpu.matmul %0, %1, %cst {dimension_numbers = #tpu.dot_dimension_numbers<[1], [0], [0], [1], [0, 0, 1, 1], [], []>} : vector<64x20xbf16>, vector<20x128xbf16>, vector<64x128xf32> -> vector<64x128xf32>
    %c0_3 = arith.constant 0 : index
    %c0_4 = arith.constant 0 : index
    %3 = vector.load %arg2[%c0_3, %c0_4] : memref<64x128xf32, #tpu.memory_space<vmem>>, vector<64x128xf32>
    %4 = arith.addf %2, %3 : vector<64x128xf32>
    %c0_5 = arith.constant 0 : index
    %c0_6 = arith.constant 0 : index
    %5 = vector.load %arg4[%c0_5, %c0_6] : memref<1x128xf32, #tpu.memory_space<vmem>>, vector<1x128xf32>
    %c0_7 = arith.constant 0 : index
    %c0_8 = arith.constant 0 : index
    %6 = vector.load %arg5[%c0_7, %c0_8] : memref<1x128xf32, #tpu.memory_space<vmem>>, vector<1x128xf32>
    %cst_9 = arith.constant dense<0.000000e+00> : vector<64xf32>
    %7 = vector.multi_reduction <add>, %4, %cst_9 [1] : vector<64x128xf32> to vector<64xf32>
    %8 = vector.shape_cast %7 : vector<64xf32> to vector<64x1xf32>
    %cst_10 = arith.constant 1.280000e+02 : f32
    %9 = vector.broadcast %cst_10 : f32 to vector<64x1xf32>
    %10 = arith.divf %8, %9 : vector<64x1xf32>
    %11 = vector.broadcast %10 : vector<64x1xf32> to vector<64x128xf32>
    %12 = arith.subf %4, %11 : vector<64x128xf32>
    %13 = arith.mulf %12, %12 : vector<64x128xf32>
    %cst_11 = arith.constant dense<0.000000e+00> : vector<64xf32>
    %14 = vector.multi_reduction <add>, %13, %cst_11 [1] : vector<64x128xf32> to vector<64xf32>
    %15 = vector.shape_cast %14 : vector<64xf32> to vector<64x1xf32>
    %cst_12 = arith.constant 1.280000e+02 : f32
    %16 = vector.broadcast %cst_12 : f32 to vector<64x1xf32>
    %17 = arith.divf %15, %16 : vector<64x1xf32>
    %18 = vector.broadcast %10 : vector<64x1xf32> to vector<64x128xf32>
    %19 = arith.subf %4, %18 : vector<64x128xf32>
    %cst_13 = arith.constant 9.99999974E-6 : f32
    %20 = vector.broadcast %cst_13 : f32 to vector<64x1xf32>
    %21 = arith.addf %17, %20 : vector<64x1xf32>
    %22 = math.rsqrt %21 : vector<64x1xf32>
    %23 = vector.broadcast %22 : vector<64x1xf32> to vector<64x128xf32>
    %24 = arith.mulf %19, %23 : vector<64x128xf32>
    %25 = vector.broadcast %5 : vector<1x128xf32> to vector<64x128xf32>
    %26 = arith.mulf %24, %25 : vector<64x128xf32>
    %27 = vector.broadcast %6 : vector<1x128xf32> to vector<64x128xf32>
    %28 = arith.addf %26, %27 : vector<64x128xf32>
    %29 = arith.truncf %28 : vector<64x128xf32> to vector<64x128xbf16>
    %c0_14 = arith.constant 0 : index
    %c0_15 = arith.constant 0 : index
    %30 = vector.load %arg6[%c0_14, %c0_15] : memref<128x384xbf16, #tpu.memory_space<vmem>>, vector<128x384xbf16>
    %cst_16 = arith.constant dense<0.000000e+00> : vector<64x384xf32>
    %31 = tpu.matmul %29, %30, %cst_16 {dimension_numbers = #tpu.dot_dimension_numbers<[1], [0], [0], [1], [0, 0, 1, 1], [], []>} : vector<64x128xbf16>, vector<128x384xbf16>, vector<64x384xf32> -> vector<64x384xf32>
    %c0_17 = arith.constant 0 : index
    %c0_18 = arith.constant 0 : index
    %32 = vector.load %arg7[%c0_17, %c0_18] : memref<1x384xf32, #tpu.memory_space<vmem>>, vector<1x384xf32>
    %33 = vector.broadcast %32 : vector<1x384xf32> to vector<64x384xf32>
    %34 = arith.addf %31, %33 : vector<64x384xf32>
    %35 = vector.extract_strided_slice %34 {offsets = [0, 0], sizes = [64, 128], strides = [1, 1]} : vector<64x384xf32> to vector<64x128xf32>
    %36 = vector.extract_strided_slice %34 {offsets = [0, 128], sizes = [64, 128], strides = [1, 1]} : vector<64x384xf32> to vector<64x128xf32>
    %37 = vector.extract_strided_slice %34 {offsets = [0, 256], sizes = [64, 128], strides = [1, 1]} : vector<64x384xf32> to vector<64x128xf32>
    %c0_19 = arith.constant 0 : index
    %c0_20 = arith.constant 0 : index
    %38 = vector.load %arg3[%c0_19, %c0_20] : memref<64x64xf32, #tpu.memory_space<vmem>>, vector<64x64xf32>
    %39 = arith.truncf %35 : vector<64x128xf32> to vector<64x128xbf16>
    %40 = arith.truncf %36 : vector<64x128xf32> to vector<64x128xbf16>
    %cst_21 = arith.constant dense<0.000000e+00> : vector<64x64xf32>
    %41 = tpu.matmul %39, %40, %cst_21 {dimension_numbers = #tpu.dot_dimension_numbers<[1], [1], [0], [0], [0, 0, 1, 0], [], []>} : vector<64x128xbf16>, vector<64x128xbf16>, vector<64x64xf32> -> vector<64x64xf32>
    %cst_22 = arith.constant 0.0883883461 : f32
    %42 = vector.broadcast %cst_22 : f32 to vector<64x64xf32>
    %43 = arith.mulf %41, %42 : vector<64x64xf32>
    %44 = arith.addf %43, %38 : vector<64x64xf32>
    %cst_23 = arith.constant dense<0xFF800000> : vector<64xf32>
    %45 = vector.multi_reduction <maximumf>, %44, %cst_23 [1] : vector<64x64xf32> to vector<64xf32>
    %46 = vector.shape_cast %45 : vector<64xf32> to vector<64x1xf32>
    %47 = vector.broadcast %46 : vector<64x1xf32> to vector<64x64xf32>
    %48 = arith.subf %44, %47 : vector<64x64xf32>
    %49 = math.exp %48 : vector<64x64xf32>
    %cst_24 = arith.constant dense<0.000000e+00> : vector<64xf32>
    %50 = vector.multi_reduction <add>, %49, %cst_24 [1] : vector<64x64xf32> to vector<64xf32>
    %51 = vector.shape_cast %50 : vector<64xf32> to vector<64x1xf32>
    %52 = tpu.reciprocal %51 {approx = true} : vector<64x1xf32> -> vector<64x1xf32>
    %53 = vector.broadcast %52 : vector<64x1xf32> to vector<64x64xf32>
    %54 = arith.mulf %49, %53 : vector<64x64xf32>
    %55 = arith.truncf %54 : vector<64x64xf32> to vector<64x64xbf16>
    %56 = arith.truncf %37 : vector<64x128xf32> to vector<64x128xbf16>
    %cst_25 = arith.constant dense<0.000000e+00> : vector<64x128xf32>
    %57 = tpu.matmul %55, %56, %cst_25 {dimension_numbers = #tpu.dot_dimension_numbers<[1], [0], [0], [1], [0, 0, 1, 1], [], []>} : vector<64x64xbf16>, vector<64x128xbf16>, vector<64x128xf32> -> vector<64x128xf32>
    %58 = arith.truncf %57 : vector<64x128xf32> to vector<64x128xbf16>
    %c0_26 = arith.constant 0 : index
    %c0_27 = arith.constant 0 : index
    %59 = vector.load %arg8[%c0_26, %c0_27] : memref<128x128xbf16, #tpu.memory_space<vmem>>, vector<128x128xbf16>
    %cst_28 = arith.constant dense<0.000000e+00> : vector<64x128xf32>
    %60 = tpu.matmul %58, %59, %cst_28 {dimension_numbers = #tpu.dot_dimension_numbers<[1], [0], [0], [1], [0, 0, 1, 1], [], []>} : vector<64x128xbf16>, vector<128x128xbf16>, vector<64x128xf32> -> vector<64x128xf32>
    %c0_29 = arith.constant 0 : index
    %c0_30 = arith.constant 0 : index
    %61 = vector.load %arg9[%c0_29, %c0_30] : memref<1x128xf32, #tpu.memory_space<vmem>>, vector<1x128xf32>
    %62 = vector.broadcast %61 : vector<1x128xf32> to vector<64x128xf32>
    %63 = arith.addf %60, %62 : vector<64x128xf32>
    %64 = arith.addf %4, %63 : vector<64x128xf32>
    %c0_31 = arith.constant 0 : index
    %c0_32 = arith.constant 0 : index
    %65 = vector.load %arg10[%c0_31, %c0_32] : memref<1x128xf32, #tpu.memory_space<vmem>>, vector<1x128xf32>
    %c0_33 = arith.constant 0 : index
    %c0_34 = arith.constant 0 : index
    %66 = vector.load %arg11[%c0_33, %c0_34] : memref<1x128xf32, #tpu.memory_space<vmem>>, vector<1x128xf32>
    %cst_35 = arith.constant dense<0.000000e+00> : vector<64xf32>
    %67 = vector.multi_reduction <add>, %64, %cst_35 [1] : vector<64x128xf32> to vector<64xf32>
    %68 = vector.shape_cast %67 : vector<64xf32> to vector<64x1xf32>
    %cst_36 = arith.constant 1.280000e+02 : f32
    %69 = vector.broadcast %cst_36 : f32 to vector<64x1xf32>
    %70 = arith.divf %68, %69 : vector<64x1xf32>
    %71 = vector.broadcast %70 : vector<64x1xf32> to vector<64x128xf32>
    %72 = arith.subf %64, %71 : vector<64x128xf32>
    %73 = arith.mulf %72, %72 : vector<64x128xf32>
    %cst_37 = arith.constant dense<0.000000e+00> : vector<64xf32>
    %74 = vector.multi_reduction <add>, %73, %cst_37 [1] : vector<64x128xf32> to vector<64xf32>
    %75 = vector.shape_cast %74 : vector<64xf32> to vector<64x1xf32>
    %cst_38 = arith.constant 1.280000e+02 : f32
    %76 = vector.broadcast %cst_38 : f32 to vector<64x1xf32>
    %77 = arith.divf %75, %76 : vector<64x1xf32>
    %78 = vector.broadcast %70 : vector<64x1xf32> to vector<64x128xf32>
    %79 = arith.subf %64, %78 : vector<64x128xf32>
    %cst_39 = arith.constant 9.99999974E-6 : f32
    %80 = vector.broadcast %cst_39 : f32 to vector<64x1xf32>
    %81 = arith.addf %77, %80 : vector<64x1xf32>
    %82 = math.rsqrt %81 : vector<64x1xf32>
    %83 = vector.broadcast %82 : vector<64x1xf32> to vector<64x128xf32>
    %84 = arith.mulf %79, %83 : vector<64x128xf32>
    %85 = vector.broadcast %65 : vector<1x128xf32> to vector<64x128xf32>
    %86 = arith.mulf %84, %85 : vector<64x128xf32>
    %87 = vector.broadcast %66 : vector<1x128xf32> to vector<64x128xf32>
    %88 = arith.addf %86, %87 : vector<64x128xf32>
    %89 = arith.truncf %88 : vector<64x128xf32> to vector<64x128xbf16>
    %c0_40 = arith.constant 0 : index
    %c0_41 = arith.constant 0 : index
    %90 = vector.load %arg12[%c0_40, %c0_41] : memref<128x128xbf16, #tpu.memory_space<vmem>>, vector<128x128xbf16>
    %cst_42 = arith.constant dense<0.000000e+00> : vector<64x128xf32>
    %91 = tpu.matmul %89, %90, %cst_42 {dimension_numbers = #tpu.dot_dimension_numbers<[1], [0], [0], [1], [0, 0, 1, 1], [], []>} : vector<64x128xbf16>, vector<128x128xbf16>, vector<64x128xf32> -> vector<64x128xf32>
    %c0_43 = arith.constant 0 : index
    %c0_44 = arith.constant 0 : index
    %92 = vector.load %arg13[%c0_43, %c0_44] : memref<1x128xf32, #tpu.memory_space<vmem>>, vector<1x128xf32>
    %93 = vector.broadcast %92 : vector<1x128xf32> to vector<64x128xf32>
    %94 = arith.addf %91, %93 : vector<64x128xf32>
    %cst_45 = arith.constant 5.000000e-01 : f32
    %95 = vector.broadcast %cst_45 : f32 to vector<64x128xf32>
    %96 = arith.mulf %95, %94 : vector<64x128xf32>
    %cst_46 = arith.constant 0.707106769 : f32
    %97 = vector.broadcast %cst_46 : f32 to vector<64x128xf32>
    %98 = arith.mulf %94, %97 : vector<64x128xf32>
    %99 = math.absf %98 : vector<64x128xf32>
    %cst_47 = arith.constant 0.327591091 : f32
    %100 = vector.broadcast %cst_47 : f32 to vector<64x128xf32>
    %101 = arith.mulf %100, %99 : vector<64x128xf32>
    %cst_48 = arith.constant 1.000000e+00 : f32
    %102 = vector.broadcast %cst_48 : f32 to vector<64x128xf32>
    %103 = arith.addf %102, %101 : vector<64x128xf32>
    %cst_49 = arith.constant 1.000000e+00 : f32
    %104 = vector.broadcast %cst_49 : f32 to vector<64x128xf32>
    %105 = arith.divf %104, %103 : vector<64x128xf32>
    %cst_50 = arith.constant 1.06140542 : f32
    %106 = vector.broadcast %cst_50 : f32 to vector<64x128xf32>
    %107 = arith.mulf %106, %105 : vector<64x128xf32>
    %cst_51 = arith.constant -1.45315206 : f32
    %108 = vector.broadcast %cst_51 : f32 to vector<64x128xf32>
    %109 = arith.addf %107, %108 : vector<64x128xf32>
    %110 = arith.mulf %109, %105 : vector<64x128xf32>
    %cst_52 = arith.constant 1.42141378 : f32
    %111 = vector.broadcast %cst_52 : f32 to vector<64x128xf32>
    %112 = arith.addf %110, %111 : vector<64x128xf32>
    %113 = arith.mulf %112, %105 : vector<64x128xf32>
    %cst_53 = arith.constant -0.284496725 : f32
    %114 = vector.broadcast %cst_53 : f32 to vector<64x128xf32>
    %115 = arith.addf %113, %114 : vector<64x128xf32>
    %116 = arith.mulf %115, %105 : vector<64x128xf32>
    %cst_54 = arith.constant 0.254829586 : f32
    %117 = vector.broadcast %cst_54 : f32 to vector<64x128xf32>
    %118 = arith.addf %116, %117 : vector<64x128xf32>
    %119 = arith.mulf %118, %105 : vector<64x128xf32>
    %cst_55 = arith.constant 0.000000e+00 : f32
    %120 = vector.broadcast %cst_55 : f32 to vector<64x128xf32>
    %121 = arith.subf %120, %99 : vector<64x128xf32>
    %122 = arith.mulf %121, %99 : vector<64x128xf32>
    %123 = math.exp %122 : vector<64x128xf32>
    %124 = arith.mulf %119, %123 : vector<64x128xf32>
    %cst_56 = arith.constant 1.000000e+00 : f32
    %125 = vector.broadcast %cst_56 : f32 to vector<64x128xf32>
    %126 = arith.subf %125, %124 : vector<64x128xf32>
    %cst_57 = arith.constant 0.000000e+00 : f32
    %127 = vector.broadcast %cst_57 : f32 to vector<64x128xf32>
    %128 = arith.cmpf oge, %98, %127 : vector<64x128xf32>
    %cst_58 = arith.constant 0.000000e+00 : f32
    %129 = vector.broadcast %cst_58 : f32 to vector<64x128xf32>
    %130 = arith.subf %129, %126 : vector<64x128xf32>
    %131 = arith.select %128, %126, %130 : vector<64x128xi1>, vector<64x128xf32>
    %cst_59 = arith.constant 1.000000e+00 : f32
    %132 = vector.broadcast %cst_59 : f32 to vector<64x128xf32>
    %133 = arith.addf %132, %131 : vector<64x128xf32>
    %134 = arith.mulf %96, %133 : vector<64x128xf32>
    %135 = arith.truncf %134 : vector<64x128xf32> to vector<64x128xbf16>
    %c0_60 = arith.constant 0 : index
    %c0_61 = arith.constant 0 : index
    %136 = vector.load %arg14[%c0_60, %c0_61] : memref<128x128xbf16, #tpu.memory_space<vmem>>, vector<128x128xbf16>
    %cst_62 = arith.constant dense<0.000000e+00> : vector<64x128xf32>
    %137 = tpu.matmul %135, %136, %cst_62 {dimension_numbers = #tpu.dot_dimension_numbers<[1], [0], [0], [1], [0, 0, 1, 1], [], []>} : vector<64x128xbf16>, vector<128x128xbf16>, vector<64x128xf32> -> vector<64x128xf32>
    %c0_63 = arith.constant 0 : index
    %c0_64 = arith.constant 0 : index
    %138 = vector.load %arg15[%c0_63, %c0_64] : memref<1x128xf32, #tpu.memory_space<vmem>>, vector<1x128xf32>
    %139 = vector.broadcast %138 : vector<1x128xf32> to vector<64x128xf32>
    %140 = arith.addf %137, %139 : vector<64x128xf32>
    %141 = arith.addf %64, %140 : vector<64x128xf32>
    %c0_65 = arith.constant 0 : index
    %c0_66 = arith.constant 0 : index
    %142 = vector.load %arg16[%c0_65, %c0_66] : memref<1x128xf32, #tpu.memory_space<vmem>>, vector<1x128xf32>
    %c0_67 = arith.constant 0 : index
    %c0_68 = arith.constant 0 : index
    %143 = vector.load %arg17[%c0_67, %c0_68] : memref<1x128xf32, #tpu.memory_space<vmem>>, vector<1x128xf32>
    %cst_69 = arith.constant dense<0.000000e+00> : vector<64xf32>
    %144 = vector.multi_reduction <add>, %141, %cst_69 [1] : vector<64x128xf32> to vector<64xf32>
    %145 = vector.shape_cast %144 : vector<64xf32> to vector<64x1xf32>
    %cst_70 = arith.constant 1.280000e+02 : f32
    %146 = vector.broadcast %cst_70 : f32 to vector<64x1xf32>
    %147 = arith.divf %145, %146 : vector<64x1xf32>
    %148 = vector.broadcast %147 : vector<64x1xf32> to vector<64x128xf32>
    %149 = arith.subf %141, %148 : vector<64x128xf32>
    %150 = arith.mulf %149, %149 : vector<64x128xf32>
    %cst_71 = arith.constant dense<0.000000e+00> : vector<64xf32>
    %151 = vector.multi_reduction <add>, %150, %cst_71 [1] : vector<64x128xf32> to vector<64xf32>
    %152 = vector.shape_cast %151 : vector<64xf32> to vector<64x1xf32>
    %cst_72 = arith.constant 1.280000e+02 : f32
    %153 = vector.broadcast %cst_72 : f32 to vector<64x1xf32>
    %154 = arith.divf %152, %153 : vector<64x1xf32>
    %155 = vector.broadcast %147 : vector<64x1xf32> to vector<64x128xf32>
    %156 = arith.subf %141, %155 : vector<64x128xf32>
    %cst_73 = arith.constant 9.99999974E-6 : f32
    %157 = vector.broadcast %cst_73 : f32 to vector<64x1xf32>
    %158 = arith.addf %154, %157 : vector<64x1xf32>
    %159 = math.rsqrt %158 : vector<64x1xf32>
    %160 = vector.broadcast %159 : vector<64x1xf32> to vector<64x128xf32>
    %161 = arith.mulf %156, %160 : vector<64x128xf32>
    %162 = vector.broadcast %142 : vector<1x128xf32> to vector<64x128xf32>
    %163 = arith.mulf %161, %162 : vector<64x128xf32>
    %164 = vector.broadcast %143 : vector<1x128xf32> to vector<64x128xf32>
    %165 = arith.addf %163, %164 : vector<64x128xf32>
    %166 = arith.truncf %165 : vector<64x128xf32> to vector<64x128xbf16>
    %c0_74 = arith.constant 0 : index
    %c0_75 = arith.constant 0 : index
    %167 = vector.load %arg18[%c0_74, %c0_75] : memref<128x128xbf16, #tpu.memory_space<vmem>>, vector<128x128xbf16>
    %cst_76 = arith.constant dense<0.000000e+00> : vector<64x128xf32>
    %168 = tpu.matmul %166, %167, %cst_76 {dimension_numbers = #tpu.dot_dimension_numbers<[1], [0], [0], [1], [0, 0, 1, 1], [], []>} : vector<64x128xbf16>, vector<128x128xbf16>, vector<64x128xf32> -> vector<64x128xf32>
    %c0_77 = arith.constant 0 : index
    %c0_78 = arith.constant 0 : index
    %169 = vector.load %arg19[%c0_77, %c0_78] : memref<1x128xf32, #tpu.memory_space<vmem>>, vector<1x128xf32>
    %170 = vector.broadcast %169 : vector<1x128xf32> to vector<64x128xf32>
    %171 = arith.addf %168, %170 : vector<64x128xf32>
    %c0_79 = arith.constant 0 : index
    %c0_80 = arith.constant 0 : index
    %172 = vector.load %arg20[%c0_79, %c0_80] : memref<64x128xf32, #tpu.memory_space<vmem>>, vector<64x128xf32>
    tpu.vector_store %arg20[%c0_79, %c0_80], %171 {strides = array<i32>} : memref<64x128xf32, #tpu.memory_space<vmem>>, vector<64x128xf32>,
    return
  }
}

</mosaic_0001>

<bundles_post_ra>
// kernel: tpu_custom_call.1
= control target key start
LH: loop header
LB: loop body
LE: loop exit
PB: predicated region body
PF: predicated region fallthrough
CT: control target
= control target key end

     0   :  { %s3531_s0 = inlined_call_operand.hbm [shape: bf16[20,128], index: 0, kind: input, shape index: {}]   ;;  %s3532_s1 = inlined_call_operand.vmem [shape: bf16[64,20], index: 1, kind: input, shape index: {}]   ;;  %s3533_s2 = inlined_call_operand.hbm [shape: f32[64,128], index: 2, kind: input, shape index: {}]   ;;  %s3534_s3 = inlined_call_operand.hbm [shape: f32[64,64], index: 3, kind: input, shape index: {}]   ;;  %s3535_s4 = inlined_call_operand.vmem [shape: f32[1,128], index: 4, kind: input, shape index: {}]   ;;  %s3536_s5 = inlined_call_operand.hbm [shape: f32[1,128], index: 5, kind: input, shape index: {}]   ;;  %s3537_s6 = inlined_call_operand.hbm [shape: bf16[128,384], index: 6, kind: input, shape index: {}]   ;;  %s3538_s7 = inlined_call_operand.hbm [shape: f32[1,384], index: 7, kind: input, shape index: {}]   ;;  %s3539_s8 = inlined_call_operand.hbm [shape: bf16[128,128], index: 8, kind: input, shape index: {}]   ;;  %s3540_s9 = inlined_call_operand.hbm [shape: f32[1,128], index: 9, kind: input, shape index: {}]   ;;  %s3541_s10 = inlined_call_operand.hbm [shape: f32[1,128], index: 10, kind: input, shape index: {}]   ;;  %s3542_s11 = inlined_call_operand.hbm [shape: f32[1,128], index: 11, kind: input, shape index: {}]   ;;  %s3543_s12 = inlined_call_operand.vmem [shape: bf16[128,128], index: 12, kind: input, shape index: {}]   ;;  %s3544_s13 = inlined_call_operand.vmem [shape: f32[1,128], index: 13, kind: input, shape index: {}]   ;;  %s3545_s14 = inlined_call_operand.hbm [shape: bf16[128,128], index: 14, kind: input, shape index: {}]   ;;  %s3546_s15 = inlined_call_operand.vmem [shape: f32[1,128], index: 15, kind: input, shape index: {}]   ;;  %s3547_s16 = inlined_call_operand.vmem [shape: f32[1,128], index: 16, kind: input, shape index: {}]   ;;  %s3548_s17 = inlined_call_operand.vmem [shape: f32[1,128], index: 17, kind: input, shape index: {}]   ;;  %s3549_s18 = inlined_call_operand.hbm [shape: bf16[128,128], index: 18, kind: input, shape index: {}]   ;;  %s3550_s19 = inlined_call_operand.vmem [shape: f32[1,128], index: 19, kind: input, shape index: {}]   ;;  %s3551_s20 = inlined_call_operand.hbm [shape: f32[64,128], index: 20, kind: output, shape index: {}]  }
   0x1   :  { %3553 = sst [smem:[#allocation31_spill]] %s3531_s0 }
   0x2   :  { %3554 = sst [smem:[#allocation32_spill]] %s3532_s1 }
   0x3   :  { %3555 = sst [smem:[#allocation33_spill]] %s3533_s2 }
   0x4   :  { %3556 = sst [smem:[#allocation34_spill]] %s3534_s3 }
   0x5   :  { %3557 = sst [smem:[#allocation35_spill]] %s3535_s4 }
   0x6   :  { %25 = vsyncpa [#allocation3], 0 }
   0x7   :  { %26 = vsyncpa [#allocation6], 0 }
   0x8   :  { %27 = vsyncpa [#allocation9], 0 }
   0x9   :  { %28 = vsyncpa [#allocation12], 0 }
   0xa   :  { %29 = vsyncpa [#allocation15], 0 }
   0xb   :  { %30 = vsyncpa [#allocation18], 0 }
   0xc   :  { %31 = vsyncpa [#allocation21], 0 }
   0xd   :  { %32 = vsyncpa [#allocation4], 0  ;;  %s2923_s1 = smov [#allocation5]  }
   0xe   :  { %s52_s22 = sshll.u32 %s2923_s1, 4  ;;  %s53_s22 = int_to_ptr.vmem [resolvable:$true] %s52_s22 }
   0xf   :  { %s2655_s23 = scalar_lea.vmem %s53_s22, 1024  ;;  %p2660_p1 = scmp.lt.s32.totalorder %s53_s22, %s53_s22 }
  0x10   :  { %p2656_p0 = scmp.ne.s32.totalorder %s53_s22, %s2655_s23  ;;  %p2661_p2 = scmp.lt.s32.totalorder %s2655_s23, %s2655_s23 }
  0x12   :  { %p2662_p3 = por %p2661_p2, %p2660_p1 }
  0x14   :  { %p2663_p4 = pnand %p2662_p3, %p2656_p0 }
  0x16   :  { %2666 = shalt.err (!%p2663_p4)
}
  0x17   :  { %s2924_s24 = smov 128   ;;  %s2925_s2 = smov 8  }
  0x18   :  { %s3558_s26 = sld [smem:[#allocation33_spill]]  ;;  %s2926_s27 = smov [#allocation8]  }
  0x19   :  { %s79_s28 = sshll.u32 %s2926_s27, 4  ;;  %s2927_s4 = smov [#allocation11]   ;;  %s80_s28 = int_to_ptr.vmem [resolvable:$true] %s79_s28 }
  0x1a   :  { %s101_s29 = sshll.u32 %s2927_s4, 4  ;;  %s2675_s30 = scalar_lea.vmem %s80_s28, 16  ;;  %s102_s29 = int_to_ptr.vmem [resolvable:$true] %s101_s29 }
  0x1b   :  { %p2676_p5 = scmp.ne.s32.totalorder %s80_s28, %s2675_s30  ;;  %s2679_s0 = scalar_lea.vmem %s80_s28, 32 }
  0x1c   :  { %p2680_p6 = scmp.lt.s32.totalorder %s80_s28, %s80_s28  ;;  %p2681_p7 = scmp.lt.s32.totalorder %s2679_s0, %s2675_s30 }
  0x1e   :  { %58 = dma.hbm_to_vmem [thread:$0]  %s3558_s26, 1024, %s53_s22, [#allocation6], %s2924_s24, %s2924_s24, %s2925_s2  }
  0x1f   :  { %p2682_p8 = por %p2681_p7, %p2680_p6 }
  0x21   :  { %p2683_p9 = pnand %p2682_p8, %p2676_p5 }
  0x23   :  { %2686 = shalt.err (!%p2683_p9)
}
  0x24   :  { %82 = dma.hbm_to_vmem [thread:$0]  %s3536_s5, 16, %s80_s28, [#allocation9]  }
  0x25   :  { %s2695_s23 = scalar_lea.vmem %s102_s29, 48  ;;  %s2699_s22 = scalar_lea.vmem %s102_s29, 64 }
  0x26   :  { %p2696_p10 = scmp.ne.s32.totalorder %s102_s29, %s2695_s23  ;;  %p2700_p11 = scmp.lt.s32.totalorder %s102_s29, %s102_s29 }
  0x27   :  { %p2701_p12 = scmp.lt.s32.totalorder %s2699_s22, %s2695_s23 }
  0x29   :  { %p2702_p13 = por %p2701_p12, %p2700_p11 }
  0x2b   :  { %p2703_p0 = pnand %p2702_p13, %p2696_p10 }
  0x2d   :  { %2706 = shalt.err (!%p2703_p0)
}
  0x2e   :  { %104 = dma.hbm_to_vmem [thread:$0]  %s3538_s7, 48, %s102_s29, [#allocation12]  }
  0x2f   :  { %s2928_s26 = smov [#allocation14]   ;;  %s2929_s4 = smov [#allocation17]  }
  0x30   :  { %s123_s27 = sshll.u32 %s2928_s26, 4  ;;  %s143_s30 = sshll.u32 %s2929_s4, 4  ;;  %s124_s27 = int_to_ptr.vmem [resolvable:$true] %s123_s27  ;;  %s144_s30 = int_to_ptr.vmem [resolvable:$true] %s143_s30 }
  0x31   :  { %s2715_s0 = scalar_lea.vmem %s124_s27, 16  ;;  %s2719_s5 = scalar_lea.vmem %s124_s27, 32 }
  0x32   :  { %p2716_p1 = scmp.ne.s32.totalorder %s124_s27, %s2715_s0  ;;  %p2720_p2 = scmp.lt.s32.totalorder %s124_s27, %s124_s27 }
  0x33   :  { %p2721_p3 = scmp.lt.s32.totalorder %s2719_s5, %s2715_s0 }
  0x35   :  { %p2722_p4 = por %p2721_p3, %p2720_p2 }
  0x37   :  { %p2723_p5 = pnand %p2722_p4, %p2716_p1 }
  0x39   :  { %2726 = shalt.err (!%p2723_p5)
}
  0x3a   :  { %126 = dma.hbm_to_vmem [thread:$0]  %s3540_s9, 16, %s124_s27, [#allocation15]  }
  0x3b   :  { %s2735_s1 = scalar_lea.vmem %s144_s30, 16  ;;  %s2739_s7 = scalar_lea.vmem %s144_s30, 32 }
  0x3c   :  { %p2736_p6 = scmp.ne.s32.totalorder %s144_s30, %s2735_s1  ;;  %p2740_p7 = scmp.lt.s32.totalorder %s144_s30, %s144_s30 }
  0x3d   :  { %p2741_p8 = scmp.lt.s32.totalorder %s2739_s7, %s2735_s1 }
  0x3f   :  { %p2742_p9 = por %p2741_p8, %p2740_p7 }
  0x41   :  { %p2743_p10 = pnand %p2742_p9, %p2736_p6 }
  0x43   :  { %2746 = shalt.err (!%p2743_p10)
}
  0x44   :  { %146 = dma.hbm_to_vmem [thread:$0]  %s3542_s11, 16, %s144_s30, [#allocation18]  }
  0x45   :  { %s2930_s22 = smov [#allocation2]  }
  0x46   :  { %s38_s25 = sshll.u32 %s2930_s22, 4  ;;  %s39_s25 = int_to_ptr.vmem [resolvable:$true] %s38_s25 }
  0x47   :  { %s2755_s3 = scalar_lea.vmem %s39_s25, 192  ;;  %p2760_p12 = scmp.lt.s32.totalorder %s39_s25, %s39_s25 }
  0x48   :  { %p2756_p11 = scmp.ne.s32.totalorder %s39_s25, %s2755_s3  ;;  %p2761_p13 = scmp.lt.s32.totalorder %s2755_s3, %s2755_s3 }
  0x4a   :  { %p2762_p0 = por %p2761_p13, %p2760_p12 }
  0x4c   :  { %p2763_p1 = pnand %p2762_p0, %p2756_p11 }
  0x4e   :  { %2766 = shalt.err (!%p2763_p1)
}
  0x4f   :  { %s2931_s9 = smov 64   ;;  %s2932_s26 = smov 4  }
  0x50   :  { %s3559_s0 = sld [smem:[#allocation31_spill]]  ;;  %s2933_s11 = smov [#allocation7]  }
  0x51   :  { %s64_s30 = sshll.u32 %s2933_s11, 4  ;;  %s2934_s5 = smov [#allocation10]   ;;  %s65_s30 = int_to_ptr.vmem [resolvable:$true] %s64_s30 }
  0x52   :  { %s88_s28 = sshll.u32 %s2934_s5, 4  ;;  %s2775_s21 = scalar_lea.vmem %s65_s30, 1024  ;;  %s89_s28 = int_to_ptr.vmem [resolvable:$true] %s88_s28 }
  0x53   :  { %p2776_p2 = scmp.ne.s32.totalorder %s65_s30, %s2775_s21  ;;  %p2780_p3 = scmp.lt.s32.totalorder %s65_s30, %s65_s30 }
  0x54   :  { %p2781_p4 = scmp.lt.s32.totalorder %s2775_s21, %s2775_s21 }
  0x56   :  { %44 = dma.hbm_to_vmem [thread:$0]  %s3559_s0, 192, %s39_s25, [#allocation3], %s2931_s9, %s2931_s9, %s2932_s26  }
  0x57   :  { %p2782_p5 = por %p2781_p4, %p2780_p3 }
  0x59   :  { %p2783_p6 = pnand %p2782_p5, %p2776_p2 }
  0x5b   :  { %2786 = shalt.err (!%p2783_p6)
}
  0x5c   :  { %s3560_s29 = sld [smem:[#allocation34_spill]]  ;;  %s2795_s23 = scalar_lea.vmem %s89_s28, 3072 }
  0x5d   :  { %p2796_p7 = scmp.ne.s32.totalorder %s89_s28, %s2795_s23  ;;  %p2800_p8 = scmp.lt.s32.totalorder %s89_s28, %s89_s28 }
  0x5e   :  { %p2801_p9 = scmp.lt.s32.totalorder %s2795_s23, %s2795_s23 }
  0x60   :  { %p2802_p10 = por %p2801_p9, %p2800_p8 }
  0x62   :  { %70 = dma.hbm_to_vmem [thread:$0]  %s3560_s29, 1024, %s65_s30, [#allocation6], %s2924_s24, %s2924_s24, %s2925_s2  }
  0x63   :  { %p2803_p11 = pnand %p2802_p10, %p2796_p7 }
  0x65   :  { %2806 = shalt.err (!%p2803_p11)
}
  0x66   :  { %s2935_s22 = smov 192   ;;  %s2936_s25 = smov 12  }
  0x67   :  { %94 = dma.hbm_to_vmem [thread:$0]  %s3537_s6, 3072, %s89_s28, [#allocation9], %s2935_s22, %s2935_s22, %s2936_s25  }
  0x68   :  { %s2937_s4 = smov [#allocation13]   ;;  %s2938_s11 = smov [#allocation16]  }
  0x69   :  { %s110_s0 = sshll.u32 %s2937_s4, 4  ;;  %s133_s5 = sshll.u32 %s2938_s11, 4  ;;  %s111_s0 = int_to_ptr.vmem [resolvable:$true] %s110_s0  ;;  %s134_s5 = int_to_ptr.vmem [resolvable:$true] %s133_s5 }
  0x6a   :  { %s2815_s30 = scalar_lea.vmem %s111_s0, 1024  ;;  %p2820_p13 = scmp.lt.s32.totalorder %s111_s0, %s111_s0 }
  0x6b   :  { %p2816_p12 = scmp.ne.s32.totalorder %s111_s0, %s2815_s30  ;;  %p2821_p0 = scmp.lt.s32.totalorder %s2815_s30, %s2815_s30 }
  0x6d   :  { %p2822_p1 = por %p2821_p0, %p2820_p13 }
  0x6f   :  { %p2823_p2 = pnand %p2822_p1, %p2816_p12 }
  0x71   :  { %2826 = shalt.err (!%p2823_p2)
}
  0x72   :  { %116 = dma.hbm_to_vmem [thread:$0]  %s3539_s8, 1024, %s111_s0, [#allocation12], %s2931_s9, %s2931_s9, %s2932_s26  }
  0x73   :  { %s2835_s6 = scalar_lea.vmem %s134_s5, 16  ;;  %s2839_s28 = scalar_lea.vmem %s134_s5, 32 }
  0x74   :  { %p2836_p3 = scmp.ne.s32.totalorder %s134_s5, %s2835_s6  ;;  %p2840_p4 = scmp.lt.s32.totalorder %s134_s5, %s134_s5 }
  0x75   :  { %p2841_p5 = scmp.lt.s32.totalorder %s2839_s28, %s2835_s6 }
  0x77   :  { %p2842_p6 = por %p2841_p5, %p2840_p4 }
  0x79   :  { %p2843_p7 = pnand %p2842_p6, %p2836_p3 }
  0x7b   :  { %2846 = shalt.err (!%p2843_p7)
}
  0x7c   :  { %136 = dma.hbm_to_vmem [thread:$0]  %s3541_s10, 16, %s134_s5, [#allocation15]  }
  0x7d   :  { %s2939_s23 = smov [#allocation19]   ;;  %s2940_s25 = smov [#allocation20]  }
  0x7e   :  { %s156_s22 = sshll.u32 %s2939_s23, 4  ;;  %s174_s3 = sshll.u32 %s2940_s25, 4  ;;  %s157_s22 = int_to_ptr.vmem [resolvable:$true] %s156_s22  ;;  %s175_s3 = int_to_ptr.vmem [resolvable:$true] %s174_s3 }
  0x7f   :  { %s2855_s27 = scalar_lea.vmem %s157_s22, 1024  ;;  %p2860_p9 = scmp.lt.s32.totalorder %s157_s22, %s157_s22 }
  0x80   :  { %p2856_p8 = scmp.ne.s32.totalorder %s157_s22, %s2855_s27  ;;  %p2861_p10 = scmp.lt.s32.totalorder %s2855_s27, %s2855_s27 }
  0x82   :  { %p2862_p11 = por %p2861_p10, %p2860_p9 }
  0x84   :  { %p2863_p12 = pnand %p2862_p11, %p2856_p8 }
  0x86   :  { %2866 = shalt.err (!%p2863_p12)
}
  0x87   :  { %162 = dma.hbm_to_vmem [thread:$0]  %s3545_s14, 1024, %s157_s22, [#allocation18], %s2931_s9, %s2931_s9, %s2932_s26  }
  0x88   :  { %s2875_s10 = scalar_lea.vmem %s175_s3, 1024  ;;  %p2880_p0 = scmp.lt.s32.totalorder %s175_s3, %s175_s3 }
  0x89   :  { %p2876_p13 = scmp.ne.s32.totalorder %s175_s3, %s2875_s10  ;;  %p2881_p1 = scmp.lt.s32.totalorder %s2875_s10, %s2875_s10 }
  0x8b   :  { %p2882_p2 = por %p2881_p1, %p2880_p0 }
  0x8d   :  { %p2883_p3 = pnand %p2882_p2, %p2876_p13 }
  0x8f   :  { %2886 = shalt.err (!%p2883_p3)
}
  0x90   :  { %180 = dma.hbm_to_vmem [thread:$0]  %s3549_s18, 1024, %s175_s3, [#allocation21], %s2931_s9, %s2931_s9, %s2932_s26  }
  0x91   :  { %2907 = dma.done.wait [#allocation3], 192  }
  0x92   :  { %2908 = vsyncadd [#allocation3], 4294967104 }
  0x93   :  { %2909 = dma.done.wait [#allocation6], 2048  }
  0x94   :  { %2910 = vsyncadd [#allocation6], 4294965248 }
  0x95   :  { %2911 = dma.done.wait [#allocation9], 3088  }
  0x96   :  { %2912 = vsyncadd [#allocation9], 4294964208 }
  0x97   :  { %2913 = dma.done.wait [#allocation12], 1072  }
  0x98   :  { %2914 = vsyncadd [#allocation12], 4294966224 }
  0x99   :  { %2915 = dma.done.wait [#allocation15], 32  }
  0x9a   :  { %2916 = vsyncadd [#allocation15], 4294967264 }
  0x9b   :  { %2917 = dma.done.wait [#allocation18], 1040  }
  0x9c   :  { %2918 = vsyncadd [#allocation18], 4294966256 }
  0x9d   :  { %2919 = dma.done.wait [#allocation21], 1024  }
  0x9e   :  { %2920 = vsyncadd [#allocation21], 4294966272  ;;  %vm281_vm0 = vcmask 1041408   ;;  %vm268_vm1 = vcmask 162816   ;;  %v2466_v1 = vld [vmem:[#allocation2] sm:$0xff]   ;;  %s3561_s9 = sld [smem:[#allocation32_spill]] }
  0x9f   :  { %v2465_v0 = vld [vmem:[#allocation2 + $0x8] ss:$0 sps:$4 sm:$0x33]   ;;  %v233_v7 = vld [vmem:[#allocation5 + $0x10] sm:$0xff]  ;;  %v231_v9 = vld [vmem:[#allocation5] sm:$0xff]  ;;  %s3562_s29 = sld [smem:[#allocation35_spill]] }
  0xa0   :  { %2444 = vmatprep.subr.msk.bf16.mxu0 %vm281_vm0, %v2465_v0  ;;  %v283_v2 = vsel %vm281_vm0, %v2465_v0, 0  ;;  %v234_v12 = vld [vmem:[#allocation5 + $0x18] sm:$0xff]  ;;  %v232_v15 = vld [vmem:[#allocation5 + $0x8] sm:$0xff]  ;;  %v235_v20 = vld [vmem:[#allocation5 + $0x20] sm:$0xff]  ;;  %vm885_vm2 = vcmask 523264  }
  0xa1   :  { %2281 = vmatpush3.bf16.msra.mxu0 %v283_v2  ;;  %v237_v21 = vld [vmem:[#allocation5 + $0x30] sm:$0xff]  ;;  %v236_v25 = vld [vmem:[#allocation5 + $0x28] sm:$0xff]  ;;  %v238_v29 = vld [vmem:[#allocation5 + $0x38] sm:$0xff] }
  0xa2   :  { %2282 = vmatprep.subr.bf16.mxu0 %v2466_v1  ;;  %v2471_v31 = vld [vmem:[#allocation10 + $0xac] ss:$12 sps:$4 sm:$0xff]   ;;  %v2473_v32 = vld [vmem:[#allocation10 + $0xa8] ss:$12 sps:$4 sm:$0xff]   ;;  %v2476_v0 = vld [vmem:[#allocation10 + $0xb0] ss:$12 sps:$4 sm:$0xff]  }
  0xa3   :  { %650 = vmatprep.subr.bf16.mxu1 %v2471_v31  ;;  %v2474_v63 = vld [vmem:[#allocation10 + $0x94] ss:$12 sps:$4 sm:$0xff]  }
  0xa4   :  { %v2467_v3 = vld [vmem:[%s3561_s9] sm:$0xff]   ;;  %v2468_v4 = vld [vmem:[%s3561_s9 + $0x8] sm:$0xff]   ;;  %v2469_v5 = vld [vmem:[%s3561_s9 + $0x10] sm:$0xff]   ;;  %651 = vmatpush1.bf16.msra.mxu1 %v2473_v32 }
  0xa5   :  { %2284 = vmatprep.mubr.msk.bf16.mxu0 %vm268_vm1, %v2467_v3  ;;  %2283 = vmatpush3.bf16.msra.mxu0 %v2466_v1  ;;  %v2470_v6 = vld [vmem:[%s3561_s9 + $0x18] sm:$0xff]  }
  0xa6   :  { %v2477_v1 = vld [vmem:[#allocation10 + $0x90] ss:$12 sps:$4 sm:$0xff]   ;;  %652 = vmatprep.subr.bf16.mxu1 %v2474_v63  ;;  %2292 = vmatprep.subr.bf16.mxu0 %v2476_v0  ;;  %v2502_v31 = vld [vmem:[#allocation10 + $0x8] ss:$12 sps:$4 sm:$0xff]  }
  0xa8   :  { %2285 = vmatmul.mubr.msk.bf16.vlgmr.msra.gmra.mxu0 %vm268_vm1, %v2468_v4  ;;  %653 = vmatpush1.bf16.msra.mxu1 %v2477_v1  ;;  %v2478_v4 = vld [vmem:[#allocation10 + $0x7c] ss:$12 sps:$4 sm:$0xff]   ;;  %v2128_v1 = vld [vmem:[%s3562_s29] ss:$0 sm:$0xff]  ;;  %s2942_s29 = smov [#allocation22]  }
  0xa9   :  { %2288 = vmatprep.mubr.msk.bf16.mxu0 %vm268_vm1, %v2469_v5  ;;  %2293 = vmatpush3.bf16.msra.mxu0 %v2476_v0  ;;  %v2480_v5 = vld [vmem:[#allocation10 + $0x98] ss:$12 sps:$4 sm:$0xff]  }
  0xaa   :  { %654 = vmatprep.subr.bf16.mxu1 %v2478_v4  ;;  %2294 = vmatprep.subr.bf16.mxu0 %v2480_v5 }
  0xad   :  { %2295 = vmatpush3.bf16.msra.mxu0 %v2480_v5 }
  0xb0   :  { %2289 = vmatmul.mubr.msk.bf16.gmra.mxu0 %vm268_vm1, %v2470_v6  ;;  %v2481_v6 = vld [vmem:[#allocation10 + $0x78] ss:$12 sps:$4 sm:$0xff]  }
  0xb1   :  { %655 = vmatpush1.bf16.msra.mxu1 %v2481_v6 }
 0x168   :  { %v2286_v8 = vpop.f32.mrf.mxu0 }
 0x169   :  { %v3114_v10 = vadd.f32 %v2286_v8, %v233_v7  ;;  %v2482_v7 = vld [vmem:[#allocation10 + $0x64] ss:$12 sps:$4 sm:$0xff]   ;;  %v2484_v8 = vld [vmem:[#allocation10 + $0x80] ss:$12 sps:$4 sm:$0xff]  }
 0x16a   :  { %v319_v11 = vpop.f32.mrf.mxu0  ;;  %656 = vmatprep.subr.bf16.mxu1 %v2482_v7  ;;  %2296 = vmatprep.subr.bf16.mxu0 %v2484_v8 }
 0x16b   :  { %v3116_v13 = vadd.f32 %v319_v11, %v231_v9  ;;  %356 = vadd.xlane.f32.xlu1 %v3114_v10  ;;  %v2485_v9 = vld [vmem:[#allocation10 + $0x60] ss:$12 sps:$4 sm:$0xff]   ;;  %2297 = vmatpush3.bf16.msra.mxu0 %v2484_v8  ;;  %v2129_v8 = vld [vmem:[#allocation8] ss:$0 sm:$0xff] }
 0x16c   :  { %v2287_v14 = vpop.f32.mrf.mxu0  ;;  %657 = vmatpush1.bf16.msra.mxu1 %v2485_v9  ;;  %v2486_v11 = vld [vmem:[#allocation10 + $0x4c] ss:$12 sps:$4 sm:$0xff]  }
 0x16d   :  { %v3119_v16 = vadd.f32 %v2287_v14, %v234_v12  ;;  %352 = vadd.xlane.f32.xlu0 %v3116_v13  ;;  %v2488_v12 = vld [vmem:[#allocation10 + $0x68] ss:$12 sps:$4 sm:$0xff]   ;;  %658 = vmatprep.subr.bf16.mxu1 %v2486_v11 }
 0x16e   :  { %v322_v17 = vpop.f32.mrf.mxu0  ;;  %v2489_v14 = vld [vmem:[#allocation10 + $0x48] ss:$12 sps:$4 sm:$0xff]   ;;  %2298 = vmatprep.subr.bf16.mxu0 %v2488_v12 }
 0x16f   :  { %v3122_v18 = vadd.f32 %v322_v17, %v232_v15  ;;  %358 = vadd.xlane.f32.xlu1 %v3119_v16  ;;  %2299 = vmatpush3.bf16.msra.mxu0 %v2488_v12  ;;  %v2490_v15 = vld [vmem:[#allocation10 + $0x34] ss:$12 sps:$4 sm:$0xff]   ;;  %v2492_v17 = vld [vmem:[#allocation10 + $0x50] ss:$12 sps:$4 sm:$0xff]  }
 0x170   :  { %v2290_v19 = vpop.f32.mrf.mxu0  ;;  %659 = vmatpush1.bf16.msra.mxu1 %v2489_v14  ;;  %2300 = vmatprep.subr.bf16.mxu0 %v2492_v17 }
 0x171   :  { %354 = vadd.xlane.f32.xlu0 %v3122_v18  ;;  %v3128_v26 = vadd.f32 %v2290_v19, %v237_v21  ;;  %v2493_v19 = vld [vmem:[#allocation10 + $0x30] ss:$12 sps:$4 sm:$0xff]   ;;  %660 = vmatprep.subr.bf16.mxu1 %v2490_v15  ;;  %v2496_v21 = vld [vmem:[#allocation10 + $0x38] ss:$12 sps:$4 sm:$0xff]  }
 0x172   :  { %v335_v22 = vpop.f32.mrf.mxu0 }
 0x173   :  { %v3126_v23 = vadd.f32 %v335_v22, %v235_v20  ;;  %2301 = vmatpush3.bf16.msra.mxu0 %v2492_v17  ;;  %v2494_v20 = vld [vmem:[#allocation10 + $0x1c] ss:$12 sps:$4 sm:$0xff]   ;;  %v2497_v22 = vld [vmem:[#allocation10 + $0x18] ss:$12 sps:$4 sm:$0xff]  }
 0x174   :  { %v2291_v24 = vpop.f32.mrf.mxu0  ;;  %661 = vmatpush1.bf16.msra.mxu1 %v2493_v19  ;;  %2302 = vmatprep.subr.bf16.mxu0 %v2496_v21 }
 0x175   :  { %360 = vadd.xlane.f32.xlu0 %v3126_v23  ;;  %v3135_v30 = vadd.f32 %v2291_v24, %v238_v29  ;;  %662 = vmatprep.subr.bf16.mxu1 %v2494_v20  ;;  %v2498_v24 = vld [vmem:[#allocation10 + $0x4] ss:$12 sps:$4 sm:$0xff]   ;;  %v2941_v29 = vmov 0  }
 0x176   :  { %v338_v27 = vpop.f32.mrf.mxu0  ;;  %682 = vmatprep.mubr.bf16.mxu1 %v2941_v29 }
 0x177   :  { %v3131_v28 = vadd.f32 %v338_v27, %v236_v25  ;;  %2303 = vmatpush3.bf16.msra.mxu0 %v2496_v21  ;;  %v2500_v25 = vld [vmem:[#allocation10 + $0x20] ss:$12 sps:$4 sm:$0xff]  }
 0x178   :  { %663 = vmatpush1.bf16.msra.mxu1 %v2497_v22  ;;  %v2501_v27 = vld [vmem:[#allocation10] ss:$12 sps:$4 sm:$0xff]   ;;  %2304 = vmatprep.subr.bf16.mxu0 %v2500_v25 }
 0x179   :  { %362 = vadd.xlane.f32.xlu1 %v3131_v28  ;;  %364 = vadd.xlane.f32.xlu0 %v3128_v26 }
 0x17a   :  { %664 = vmatprep.subr.bf16.mxu1 %v2498_v24 }
 0x17b   :  { %2305 = vmatpush3.bf16.msra.mxu0 %v2500_v25 }
 0x17c   :  { %665 = vmatpush1.bf16.msra.mxu1 %v2501_v27  ;;  %2306 = vmatprep.subr.bf16.mxu0 %v2502_v31 }
 0x17d   :  { %366 = vadd.xlane.f32.xlu1 %v3135_v30 }
 0x17f   :  { %2307 = vmatpush3.bf16.msra.mxu0 %v2502_v31 }
 0x1f4   :  { %v357_v33 = vpop.xlane.xlu1 %356 }
 0x1f5   :  { %v371_v35 = vmul.f32 0.0078125, %v357_v33 }
 0x1f6   :  { %v353_v34 = vpop.xlane.xlu0 %352 }
 0x1f7   :  { %v369_v36 = vmul.f32 0.0078125, %v353_v34  ;;  %v3142_v40 = vsub.f32 %v3114_v10, %v371_v35 }
 0x1f8   :  { %v359_v37 = vpop.xlane.xlu1 %358 }
 0x1f9   :  { %v3139_v38 = vsub.f32 %v3116_v13, %v369_v36  ;;  %v372_v41 = vmul.f32 0.0078125, %v359_v37  ;;  %v387_v48 = vmul.f32 %v3142_v40, %v3142_v40 }
 0x1fa   :  { %v355_v39 = vpop.xlane.xlu0 %354 }
 0x1fb   :  { %v370_v42 = vmul.f32 0.0078125, %v355_v39  ;;  %v385_v43 = vmul.f32 %v3139_v38, %v3139_v38  ;;  %v3150_v46 = vsub.f32 %v3119_v16, %v372_v41 }
 0x1fd   :  { %v3147_v44 = vsub.f32 %v3122_v18, %v370_v42  ;;  %393 = vadd.xlane.f32.xlu0 %v385_v43  ;;  %v388_v55 = vmul.f32 %v3150_v46, %v3150_v46 }
 0x1fe   :  { %v361_v45 = vpop.xlane.xlu0 %360 }
 0x1ff   :  { %v373_v47 = vmul.f32 0.0078125, %v361_v45  ;;  %v386_v49 = vmul.f32 %v3147_v44, %v3147_v44 }
 0x201   :  { %v3157_v50 = vsub.f32 %v3126_v23, %v373_v47  ;;  %397 = vadd.xlane.f32.xlu0 %v387_v48  ;;  %395 = vadd.xlane.f32.xlu1 %v386_v49 }
 0x202   :  { %v363_v51 = vpop.xlane.xlu1 %362  ;;  %v365_v52 = vpop.xlane.xlu0 %364 }
 0x203   :  { %v374_v53 = vmul.f32 0.0078125, %v363_v51  ;;  %v375_v54 = vmul.f32 0.0078125, %v365_v52  ;;  %v389_v56 = vmul.f32 %v3157_v50, %v3157_v50 }
 0x205   :  { %v3164_v57 = vsub.f32 %v3131_v28, %v374_v53  ;;  %v3167_v58 = vsub.f32 %v3128_v26, %v375_v54  ;;  %399 = vadd.xlane.f32.xlu1 %v388_v55  ;;  %401 = vadd.xlane.f32.xlu0 %v389_v56 }
 0x206   :  { %v367_v59 = vpop.xlane.xlu1 %366 }
 0x207   :  { %v376_v60 = vmul.f32 0.0078125, %v367_v59  ;;  %v390_v61 = vmul.f32 %v3164_v57, %v3164_v57  ;;  %v391_v62 = vmul.f32 %v3167_v58, %v3167_v58 }
 0x209   :  { %v3174_v2 = vsub.f32 %v3135_v30, %v376_v60  ;;  %403 = vadd.xlane.f32.xlu1 %v390_v61  ;;  %405 = vadd.xlane.f32.xlu0 %v391_v62 }
 0x20b   :  { %v392_v3 = vmul.f32 %v3174_v2, %v3174_v2 }
 0x20d   :  { %407 = vadd.xlane.f32.xlu1 %v392_v3 }
 0x286   :  { %v394_v32 = vpop.xlane.xlu0 %393 }
 0x287   :  { %v409_v33 = vmul.f32 0.0078125, %v394_v32 }
 0x289   :  { %v417_v34 = vadd.f32 1e-05, %v409_v33 }
 0x28a   :  { %v396_v35 = vpop.xlane.xlu1 %395  ;;  %v398_v36 = vpop.xlane.xlu0 %397 }
 0x28b   :  { %2535 = vrsqrt.f32 %v417_v34  ;;  %v410_v37 = vmul.f32 0.0078125, %v396_v35  ;;  %v411_v39 = vmul.f32 0.0078125, %v398_v36 }
 0x28d   :  { %v418_v41 = vadd.f32 1e-05, %v410_v37  ;;  %v419_v42 = vadd.f32 1e-05, %v411_v39 }
 0x28e   :  { %v400_v43 = vpop.xlane.xlu1 %399  ;;  %v402_v45 = vpop.xlane.xlu0 %401 }
 0x28f   :  { %2537 = vrsqrt.f32 %v418_v41  ;;  %v412_v47 = vmul.f32 0.0078125, %v400_v43  ;;  %v413_v48 = vmul.f32 0.0078125, %v402_v45 }
 0x290   :  { %2539 = vrsqrt.f32 %v419_v42 }
 0x291   :  { %v420_v49 = vadd.f32 1e-05, %v412_v47  ;;  %v421_v51 = vadd.f32 1e-05, %v413_v48  ;;  %v505_v47 = vld [vmem:[#allocation11] sm:$0x7] }
 0x292   :  { %v404_v52 = vpop.xlane.xlu1 %403  ;;  %v406_v53 = vpop.xlane.xlu0 %405 }
 0x293   :  { %2541 = vrsqrt.f32 %v420_v49  ;;  %v414_v54 = vmul.f32 0.0078125, %v404_v52  ;;  %v415_v55 = vmul.f32 0.0078125, %v406_v53 }
 0x294   :  { %2543 = vrsqrt.f32 %v421_v51 }
 0x295   :  { %v422_v56 = vadd.f32 1e-05, %v414_v54  ;;  %v423_v59 = vadd.f32 1e-05, %v415_v55 }
 0x296   :  { %v408_v60 = vpop.xlane.xlu1 %407 }
 0x297   :  { %2545 = vrsqrt.f32 %v422_v56  ;;  %v416_v61 = vmul.f32 0.0078125, %v408_v60 }
 0x298   :  { %v2536_v62 = vpop.eup %2535  ;;  %2547 = vrsqrt.f32 %v423_v59 }
 0x299   :  { %v424_v63 = vadd.f32 1e-05, %v416_v61  ;;  %v433_v0 = vmul.f32 %v2536_v62, %v3139_v38 }
 0x29b   :  { %2549 = vrsqrt.f32 %v424_v63  ;;  %v447_v6 = vmul.f32 %v2128_v1, %v433_v0 }
 0x29c   :  { %v2538_v3 = vpop.eup %2537 }
 0x29d   :  { %v2540_v4 = vpop.eup %2539  ;;  %v434_v5 = vmul.f32 %v2538_v3, %v3147_v44  ;;  %v461_v38 = vadd.f32 %v2129_v8, %v447_v6 }
 0x29e   :  { %v435_v7 = vmul.f32 %v2540_v4, %v3142_v40 }
 0x29f   :  { %v448_v9 = vmul.f32 %v2128_v1, %v434_v5 }
 0x2a0   :  { %v2542_v11 = vpop.eup %2541  ;;  %v449_v12 = vmul.f32 %v2128_v1, %v435_v7 }
 0x2a1   :  { %v2544_v14 = vpop.eup %2543  ;;  %v436_v15 = vmul.f32 %v2542_v11, %v3150_v46  ;;  %v462_v17 = vadd.f32 %v2129_v8, %v448_v9 }
 0x2a2   :  { %v437_v19 = vmul.f32 %v2544_v14, %v3157_v50  ;;  %v463_v24 = vadd.f32 %v2129_v8, %v449_v12 }
 0x2a3   :  { %v469_v20 = vpack.c.bf16 %v462_v17, %v461_v38  ;;  %v450_v21 = vmul.f32 %v2128_v1, %v436_v15 }
 0x2a4   :  { %v2546_v22 = vpop.eup %2545  ;;  %v451_v27 = vmul.f32 %v2128_v1, %v437_v19 }
 0x2a5   :  { %v2548_v25 = vpop.eup %2547  ;;  %683 = vmatmul.mubr.bf16.vlgmr.msra.gmra.mxu1 %v469_v20  ;;  %2308 = vmatprep.mubr.bf16.mxu0 %v469_v20  ;;  %v464_v44 = vadd.f32 %v2129_v8, %v450_v21  ;;  %v438_v40 = vmul.f32 %v2546_v22, %v3164_v57 }
 0x2a6   :  { %692 = vmatprep.mubr.bf16.mxu1 %v2941_v29  ;;  %v439_v31 = vmul.f32 %v2548_v25, %v3167_v58  ;;  %v465_v50 = vadd.f32 %v2129_v8, %v451_v27  ;;  %v507_v58 = vlaneseq }
 0x2a7   :  { %v470_v46 = vpack.c.bf16 %v464_v44, %v463_v24  ;;  %v452_v32 = vmul.f32 %v2128_v1, %v438_v40 }
 0x2a8   :  { %v2550_v33 = vpop.eup %2549  ;;  %v453_v36 = vmul.f32 %v2128_v1, %v439_v31  ;;  %v508_v43 = vshrl.u32 %v507_v58, 7 }
 0x2a9   :  { %2309 = vmatmul.mubr.bf16.vlgmr.msra.gmra.mxu0 %v470_v46  ;;  %v466_v34 = vadd.f32 %v2129_v8, %v452_v32  ;;  %v440_v35 = vmul.f32 %v2550_v33, %v3174_v2 }
 0x2aa   :  { %v467_v41 = vadd.f32 %v2129_v8, %v453_v36  ;;  %v509_v45 = vsub.s32 0, %v508_v43  ;;  %v517_v63 = vsub.s32 2, %v508_v43  ;;  %v513_v25 = vsub.s32 1, %v508_v43 }
 0x2ab   :  { %v471_v37 = vpack.c.bf16 %v466_v34, %v465_v50  ;;  %v454_v39 = vmul.f32 %v2128_v1, %v440_v35 }
 0x2ac   :  { %v3193_v48 = vrot.slane %v505_v47, %v509_v45  ;;  %v518_v5 = vrot.slane %v505_v47, %v517_v63  ;;  %v514_v32 = vrot.slane %v505_v47, %v513_v25 }
 0x2ad   :  { %693 = vmatmul.mubr.bf16.gmra.mxu1 %v470_v46  ;;  %2312 = vmatprep.mubr.bf16.mxu0 %v471_v37  ;;  %v468_v57 = vadd.f32 %v2129_v8, %v454_v39 }
 0x2ae   :  { %702 = vmatprep.mubr.bf16.mxu1 %v2941_v29 }
 0x2af   :  { %v472_v42 = vpack.c.bf16 %v468_v57, %v467_v41 }
 0x2b1   :  { %2313 = vmatmul.mubr.bf16.gmra.mxu0 %v472_v42 }
 0x2b5   :  { %703 = vmatmul.mubr.bf16.gmra.mxu1 %v471_v37 }
 0x2b6   :  { %712 = vmatprep.mubr.bf16.mxu1 %v2941_v29 }
 0x2bd   :  { %713 = vmatmul.mubr.bf16.gmra.mxu1 %v472_v42 }
 0x365   :  { %v684_v2 = vpop.f32.mrf.mxu1 }
 0x366   :  { %v685_v53 = vadd.f32 %v684_v2, %v3193_v48 }
 0x367   :  { %v3195_v49 = vpop.f32.mrf.mxu1 }
 0x368   :  { %v687_v45 = vadd.f32 %v3195_v49, %v514_v32 }
 0x369   :  { %v688_v51 = vpop.f32.mrf.mxu1  ;;  %v2310_v52 = vpop.f32.mrf.mxu0 }
 0x36a   :  { %v689_v54 = vadd.f32 %v688_v51, %v3193_v48  ;;  %v766_v22 = vadd.f32 %v2310_v52, %v518_v5 }
 0x36b   :  { %v690_v55 = vpop.f32.mrf.mxu1  ;;  %v757_v56 = vpop.f32.mrf.mxu0 }
 0x36c   :  { %v796_v59 = vpack.c.bf16 %v689_v54, %v685_v53  ;;  %v758_v31 = vadd.f32 %v757_v56, %v518_v5  ;;  %v691_v43 = vadd.f32 %v690_v55, %v514_v32 }
 0x36d   :  { %v3199_v29 = vpop.f32.mrf.mxu1  ;;  %v2311_v60 = vpop.f32.mrf.mxu0 }
 0x36e   :  { %2324 = vmatprep.mubr.bf16.mxu1 %v796_v59  ;;  %v769_v19 = vadd.f32 %v2311_v60, %v518_v5  ;;  %v800_v47 = vpack.c.bf16 %v691_v43, %v687_v45  ;;  %v695_v52 = vadd.f32 %v3199_v29, %v3193_v48 }
 0x36f   :  { %v696_v61 = vpop.f32.mrf.mxu1  ;;  %v760_v62 = vpop.f32.mrf.mxu0 }
 0x370   :  { %v979_v44 = vpack.c.bf16 %v769_v19, %v766_v22  ;;  %v761_v40 = vadd.f32 %v760_v62, %v518_v5  ;;  %v697_v42 = vadd.f32 %v696_v61, %v514_v32  ;;  %v788_v62 = vld [vmem:[#allocation7] sm:$0xff] }
 0x371   :  { %v698_v0 = vpop.f32.mrf.mxu1  ;;  %v2314_v1 = vpop.f32.mrf.mxu0 }
 0x372   :  { %v782_v8 = vadd.f32 %v2314_v1, %v518_v5  ;;  %v978_v33 = vpack.c.bf16 %v761_v40, %v758_v31  ;;  %v699_v2 = vadd.f32 %v698_v0, %v3193_v48 }
 0x373   :  { %v700_v3 = vpop.f32.mrf.mxu1  ;;  %v773_v4 = vpop.f32.mrf.mxu0 }
 0x374   :  { %v774_v14 = vadd.f32 %v773_v4, %v518_v5  ;;  %v701_v57 = vadd.f32 %v700_v3, %v514_v32  ;;  %v797_v54 = vpack.c.bf16 %v699_v2, %v695_v52  ;;  %v790_v3 = vld [vmem:[#allocation7 + $0x10] sm:$0xff] }
 0x375   :  { %v704_v6 = vpop.f32.mrf.mxu1  ;;  %v2315_v7 = vpop.f32.mrf.mxu0 }
 0x376   :  { %v785_v9 = vadd.f32 %v2315_v7, %v518_v5  ;;  %v801_v58 = vpack.c.bf16 %v701_v57, %v697_v42  ;;  %v705_v53 = vadd.f32 %v704_v6, %v3193_v48  ;;  %v789_v6 = vld [vmem:[#allocation7 + $0x8] sm:$0xff] }
 0x377   :  { %v706_v11 = vpop.f32.mrf.mxu1  ;;  %v776_v12 = vpop.f32.mrf.mxu0 }
 0x378   :  { %v981_v15 = vpack.c.bf16 %v785_v9, %v782_v8  ;;  %v777_v38 = vadd.f32 %v776_v12, %v518_v5  ;;  %v707_v37 = vadd.f32 %v706_v11, %v514_v32  ;;  %v791_v11 = vld [vmem:[#allocation7 + $0x18] sm:$0xff] }
 0x379   :  { %v708_v17 = vpop.f32.mrf.mxu1 }
 0x37a   :  { %v980_v20 = vpack.c.bf16 %v777_v38, %v774_v14  ;;  %2332 = vmatprep.subr.bf16.mxu0 %v981_v15  ;;  %v709_v51 = vadd.f32 %v708_v17, %v3193_v48  ;;  %v792_v38 = vld [vmem:[#allocation7 + $0x20] sm:$0xff] }
 0x37b   :  { %v710_v21 = vpop.f32.mrf.mxu1  ;;  %2333 = vmatpush3.bf16.msra.mxu0 %v981_v15 }
 0x37c   :  { %2334 = vmatprep.subr.bf16.mxu0 %v980_v20  ;;  %v711_v34 = vadd.f32 %v710_v21, %v514_v32  ;;  %v798_v56 = vpack.c.bf16 %v709_v51, %v705_v53 }
 0x37d   :  { %v714_v24 = vpop.f32.mrf.mxu1 }
 0x37e   :  { %v802_v41 = vpack.c.bf16 %v711_v34, %v707_v37  ;;  %v715_v49 = vadd.f32 %v714_v24, %v3193_v48  ;;  %v794_v24 = vld [vmem:[#allocation7 + $0x30] sm:$0xff] }
 0x37f   :  { %v716_v27 = vpop.f32.mrf.mxu1  ;;  %2335 = vmatpush3.bf16.msra.mxu0 %v980_v20 }
 0x380   :  { %2336 = vmatprep.subr.bf16.mxu0 %v979_v44  ;;  %v717_v35 = vadd.f32 %v716_v27, %v514_v32  ;;  %v793_v27 = vld [vmem:[#allocation7 + $0x28] sm:$0xff] }
 0x381   :  { %v718_v46 = vpop.f32.mrf.mxu1 }
 0x382   :  { %v719_v55 = vadd.f32 %v718_v46, %v3193_v48 }
 0x383   :  { %v720_v50 = vpop.f32.mrf.mxu1  ;;  %2337 = vmatpush3.bf16.msra.mxu0 %v979_v44 }
 0x384   :  { %v721_v36 = vadd.f32 %v720_v50, %v514_v32  ;;  %2338 = vmatprep.subr.bf16.mxu0 %v978_v33  ;;  %v799_v59 = vpack.c.bf16 %v719_v55, %v715_v49  ;;  %v795_v50 = vld [vmem:[#allocation7 + $0x38] sm:$0xff] }
 0x386   :  { %v803_v39 = vpack.c.bf16 %v721_v36, %v717_v35 }
 0x387   :  { %2339 = vmatpush3.bf16.msra.mxu0 %v978_v33 }
 0x388   :  { %2316 = vmatprep.subr.bf16.mxu1 %v803_v39 }
 0x389   :  { %2317 = vmatpush3.bf16.xpose.msra.mxu1 %v803_v39 }
 0x38a   :  { %2318 = vmatprep.subr.bf16.mxu1 %v802_v41 }
 0x391   :  { %2319 = vmatpush3.bf16.xpose.msra.mxu1 %v802_v41 }
 0x392   :  { %2320 = vmatprep.subr.bf16.mxu1 %v801_v58 }
 0x399   :  { %2321 = vmatpush3.bf16.xpose.msra.mxu1 %v801_v58 }
 0x39a   :  { %2322 = vmatprep.subr.bf16.mxu1 %v800_v47 }
 0x3a1   :  { %2323 = vmatpush3.bf16.xpose.msra.mxu1 %v800_v47 }
 0x3a8   :  { %2325 = vmatmul.mubr.bf16.vlgmr.msra.gmra.mxu1 %v797_v54 }
 0x3a9   :  { %2328 = vmatprep.mubr.bf16.mxu1 %v798_v56 }
 0x3b0   :  { %2329 = vmatmul.mubr.bf16.gmra.mxu1 %v799_v59 }
 0x468   :  { %v2326_v60 = vpop.f32.mrf.mxu1 }
 0x469   :  { %v871_v63 = vmul.f32 0.088388346, %v2326_v60 }
 0x46a   :  { %v838_v61 = vpop.f32.mrf.mxu1 }
 0x46b   :  { %v869_v0 = vmul.f32 0.088388346, %v838_v61  ;;  %v879_v9 = vadd.f32 %v871_v63, %v790_v3 }
 0x46c   :  { %v2327_v1 = vpop.f32.mrf.mxu1 }
 0x46d   :  { %v877_v29 = vadd.f32 %v869_v0, %v788_v62  ;;  %v872_v4 = vmul.f32 0.088388346, %v2327_v1  ;;  %v892_v20 = vsel %vm885_vm2, %v879_v9, -inf }
 0x46e   :  { %v841_v5 = vpop.f32.mrf.mxu1 }
 0x46f   :  { %v870_v7 = vmul.f32 0.088388346, %v841_v5  ;;  %v886_v8 = vsel %vm885_vm2, %v877_v29, -inf  ;;  %v880_v15 = vadd.f32 %v872_v4, %v791_v11 }
 0x470   :  { %887 = vmax.xlane.f32.xlu0 %v886_v8  ;;  %v2330_v48 = vpop.f32.mrf.mxu1 }
 0x471   :  { %v878_v12 = vadd.f32 %v870_v7, %v789_v6  ;;  %v875_v17 = vmul.f32 0.088388346, %v2330_v48  ;;  %v895_v40 = vsel %vm885_vm2, %v880_v15, -inf }
 0x472   :  { %v854_v14 = vpop.f32.mrf.mxu1 }
 0x473   :  { %v873_v19 = vmul.f32 0.088388346, %v854_v14  ;;  %v889_v21 = vsel %vm885_vm2, %v878_v12, -inf  ;;  %v883_v33 = vadd.f32 %v875_v17, %v794_v24 }
 0x474   :  { %893 = vmax.xlane.f32.xlu0 %v892_v20  ;;  %890 = vmax.xlane.f32.xlu1 %v889_v21  ;;  %v2331_v22 = vpop.f32.mrf.mxu1 }
 0x475   :  { %v881_v25 = vadd.f32 %v873_v19, %v792_v38  ;;  %v876_v31 = vmul.f32 0.088388346, %v2331_v22  ;;  %v904_v35 = vsel %vm885_vm2, %v883_v33, -inf  ;;  %v2503_v22 = vld [vmem:[#allocation13 + $0x38] sm:$0xff]  }
 0x476   :  { %v857_v44 = vpop.f32.mrf.mxu1  ;;  %2348 = vmatprep.subr.bf16.mxu0 %v2503_v22 }
 0x477   :  { %v874_v46 = vmul.f32 0.088388346, %v857_v44  ;;  %v898_v32 = vsel %vm885_vm2, %v881_v25, -inf  ;;  %v884_v37 = vadd.f32 %v876_v31, %v795_v50 }
 0x478   :  { %896 = vmax.xlane.f32.xlu1 %v895_v40  ;;  %899 = vmax.xlane.f32.xlu0 %v898_v32 }
 0x479   :  { %v882_v34 = vadd.f32 %v874_v46, %v793_v27  ;;  %v907_v39 = vsel %vm885_vm2, %v884_v37, -inf }
 0x47b   :  { %v901_v36 = vsel %vm885_vm2, %v882_v34, -inf }
 0x47c   :  { %905 = vmax.xlane.f32.xlu0 %v904_v35  ;;  %902 = vmax.xlane.f32.xlu1 %v901_v36 }
 0x480   :  { %908 = vmax.xlane.f32.xlu1 %v907_v39 }
 0x4f9   :  { %v888_v41 = vpop.xlane.xlu0 %887 }
 0x4fa   :  { %v910_v57 = vsub.f32 %v877_v29, %v888_v41 }
 0x4fc   :  { %v918_v42 = vmul.f32 1.442695, %v910_v57 }
 0x4fd   :  { %v894_v58 = vpop.xlane.xlu0 %893  ;;  %v891_v43 = vpop.xlane.xlu1 %890 }
 0x4fe   :  { %2551 = vpow2.f32 %v918_v42  ;;  %v912_v45 = vsub.f32 %v879_v9, %v894_v58  ;;  %v911_v47 = vsub.f32 %v878_v12, %v891_v43  ;;  %v2504_v43 = vld [vmem:[#allocation13 + $0x30] sm:$0xff]  }
 0x500   :  { %v922_v2 = vmul.f32 1.442695, %v912_v45  ;;  %v920_v51 = vmul.f32 1.442695, %v911_v47 }
 0x501   :  { %v897_v52 = vpop.xlane.xlu1 %896  ;;  %v900_v53 = vpop.xlane.xlu0 %899 }
 0x502   :  { %2553 = vpow2.f32 %v922_v2  ;;  %v913_v54 = vsub.f32 %v880_v15, %v897_v52  ;;  %v914_v56 = vsub.f32 %v881_v25, %v900_v53 }
 0x503   :  { %2555 = vpow2.f32 %v920_v51 }
 0x504   :  { %v924_v55 = vmul.f32 1.442695, %v913_v54  ;;  %v926_v49 = vmul.f32 1.442695, %v914_v56  ;;  %v2505_v54 = vld [vmem:[#allocation13 + $0x28] sm:$0xff]  }
 0x505   :  { %v906_v59 = vpop.xlane.xlu0 %905  ;;  %v903_v60 = vpop.xlane.xlu1 %902 }
 0x506   :  { %2557 = vpow2.f32 %v924_v55  ;;  %v916_v61 = vsub.f32 %v883_v33, %v906_v59  ;;  %v915_v62 = vsub.f32 %v882_v34, %v903_v60  ;;  %v2506_v59 = vld [vmem:[#allocation13 + $0x20] sm:$0xff]   ;;  %v2507_v60 = vld [vmem:[#allocation13 + $0x18] sm:$0xff]  }
 0x507   :  { %2559 = vpow2.f32 %v926_v49 }
 0x508   :  { %v930_v63 = vmul.f32 1.442695, %v916_v61  ;;  %v928_v0 = vmul.f32 1.442695, %v915_v62  ;;  %v2508_v61 = vld [vmem:[#allocation13 + $0x10] sm:$0xff]   ;;  %v2509_v62 = vld [vmem:[#allocation13 + $0x8] sm:$0xff]  }
 0x509   :  { %v909_v1 = vpop.xlane.xlu1 %908 }
 0x50a   :  { %2561 = vpow2.f32 %v930_v63  ;;  %v917_v3 = vsub.f32 %v884_v37, %v909_v1  ;;  %v2510_v63 = vld [vmem:[#allocation13] sm:$0xff]  }
 0x50b   :  { %v2552_v29 = vpop.eup %2551  ;;  %2563 = vpow2.f32 %v928_v0 }
 0x50c   :  { %v932_v4 = vmul.f32 1.442695, %v917_v3  ;;  %v934_v5 = vsel %vm885_vm2, %v2552_v29, 0.0 }
 0x50d   :  { %935 = vadd.xlane.f32.xlu0 %v934_v5 }
 0x50e   :  { %2565 = vpow2.f32 %v932_v4 }
 0x50f   :  { %v2554_v6 = vpop.eup %2553 }
 0x510   :  { %v2556_v7 = vpop.eup %2555  ;;  %v940_v8 = vsel %vm885_vm2, %v2554_v6, 0.0 }
 0x511   :  { %941 = vadd.xlane.f32.xlu0 %v940_v8  ;;  %v937_v9 = vsel %vm885_vm2, %v2556_v7, 0.0 }
 0x512   :  { %938 = vadd.xlane.f32.xlu1 %v937_v9 }
 0x513   :  { %v2558_v11 = vpop.eup %2557 }
 0x514   :  { %v2560_v48 = vpop.eup %2559  ;;  %v943_v12 = vsel %vm885_vm2, %v2558_v11, 0.0 }
 0x515   :  { %v946_v14 = vsel %vm885_vm2, %v2560_v48, 0.0 }
 0x516   :  { %947 = vadd.xlane.f32.xlu0 %v946_v14  ;;  %944 = vadd.xlane.f32.xlu1 %v943_v12  ;;  %v2158_v14 = vld [vmem:[#allocation14] ss:$0 sm:$0xff] }
 0x517   :  { %v2562_v15 = vpop.eup %2561 }
 0x518   :  { %v2564_v38 = vpop.eup %2563  ;;  %v952_v17 = vsel %vm885_vm2, %v2562_v15, 0.0 }
 0x519   :  { %v949_v19 = vsel %vm885_vm2, %v2564_v38, 0.0 }
 0x51a   :  { %953 = vadd.xlane.f32.xlu0 %v952_v17  ;;  %950 = vadd.xlane.f32.xlu1 %v949_v19 }
 0x51b   :  { %v2566_v20 = vpop.eup %2565 }
 0x51c   :  { %v955_v21 = vsel %vm885_vm2, %v2566_v20, 0.0 }
 0x51e   :  { %956 = vadd.xlane.f32.xlu1 %v955_v21 }
 0x596   :  { %v936_v24 = vpop.xlane.xlu0 %935 }
 0x597   :  { %2567 = vrcp.f32 %v936_v24 }
 0x59a   :  { %v942_v25 = vpop.xlane.xlu0 %941 }
 0x59b   :  { %v939_v44 = vpop.xlane.xlu1 %938 }
 0x59c   :  { %2569 = vrcp.f32 %v939_v44 }
 0x59d   :  { %2571 = vrcp.f32 %v942_v25 }
 0x59f   :  { %v948_v40 = vpop.xlane.xlu0 %947  ;;  %v945_v27 = vpop.xlane.xlu1 %944 }
 0x5a0   :  { %2573 = vrcp.f32 %v945_v27 }
 0x5a1   :  { %2575 = vrcp.f32 %v948_v40 }
 0x5a3   :  { %v954_v31 = vpop.xlane.xlu0 %953  ;;  %v951_v46 = vpop.xlane.xlu1 %950 }
 0x5a4   :  { %2577 = vrcp.f32 %v951_v46  ;;  %v2568_v32 = vpop.eup %2567 }
 0x5a5   :  { %2579 = vrcp.f32 %v954_v31  ;;  %v966_v34 = vmul.f32 %v2568_v32, %v2552_v29 }
 0x5a7   :  { %v957_v33 = vpop.xlane.xlu1 %956 }
 0x5a8   :  { %2581 = vrcp.f32 %v957_v33 }
 0x5a9   :  { %v2570_v50 = vpop.eup %2569 }
 0x5aa   :  { %v967_v35 = vmul.f32 %v2570_v50, %v2556_v7  ;;  %v2572_v36 = vpop.eup %2571 }
 0x5ab   :  { %v968_v41 = vmul.f32 %v2572_v36, %v2554_v6 }
 0x5ac   :  { %v974_v37 = vpack.c.bf16 %v967_v35, %v966_v34 }
 0x5ad   :  { %v2574_v39 = vpop.eup %2573 }
 0x5ae   :  { %2340 = vmatprep.mubr.msk.bf16.mxu0 %vm885_vm2, %v974_v37  ;;  %v969_v57 = vmul.f32 %v2574_v39, %v2558_v11  ;;  %v2576_v42 = vpop.eup %2575 }
 0x5af   :  { %v970_v2 = vmul.f32 %v2576_v42, %v2560_v48 }
 0x5b0   :  { %v975_v58 = vpack.c.bf16 %v969_v57, %v968_v41 }
 0x5b1   :  { %v2578_v45 = vpop.eup %2577 }
 0x5b2   :  { %v2580_v47 = vpop.eup %2579  ;;  %2341 = vmatmul.mubr.msk.bf16.vlgmr.msra.gmra.mxu0 %vm885_vm2, %v975_v58  ;;  %v971_v51 = vmul.f32 %v2578_v45, %v2564_v38 }
 0x5b3   :  { %2349 = vmatpush3.bf16.msra.mxu0 %v2503_v22  ;;  %v972_v56 = vmul.f32 %v2580_v47, %v2562_v15 }
 0x5b4   :  { %v976_v53 = vpack.c.bf16 %v971_v51, %v970_v2  ;;  %2350 = vmatprep.subr.bf16.mxu0 %v2504_v43 }
 0x5b5   :  { %v2582_v52 = vpop.eup %2581 }
 0x5b6   :  { %v973_v55 = vmul.f32 %v2582_v52, %v2566_v20  ;;  %2344 = vmatprep.mubr.msk.bf16.mxu0 %vm885_vm2, %v976_v53 }
 0x5b7   :  { %2351 = vmatpush3.bf16.msra.mxu0 %v2504_v43 }
 0x5b8   :  { %v977_v49 = vpack.c.bf16 %v973_v55, %v972_v56  ;;  %2352 = vmatprep.subr.bf16.mxu0 %v2505_v54 }
 0x5ba   :  { %2345 = vmatmul.mubr.msk.bf16.gmra.mxu0 %vm885_vm2, %v977_v49 }
 0x5bb   :  { %2353 = vmatpush3.bf16.msra.mxu0 %v2505_v54 }
 0x5bc   :  { %2354 = vmatprep.subr.bf16.mxu0 %v2506_v59 }
 0x5bf   :  { %2355 = vmatpush3.bf16.msra.mxu0 %v2506_v59 }
 0x5c0   :  { %2356 = vmatprep.subr.bf16.mxu0 %v2507_v60 }
 0x5c3   :  { %2357 = vmatpush3.bf16.msra.mxu0 %v2507_v60 }
 0x5c4   :  { %2358 = vmatprep.subr.bf16.mxu0 %v2508_v61 }
 0x5c7   :  { %2359 = vmatpush3.bf16.msra.mxu0 %v2508_v61 }
 0x5c8   :  { %2360 = vmatprep.subr.bf16.mxu0 %v2509_v62 }
 0x5cb   :  { %2361 = vmatpush3.bf16.msra.mxu0 %v2509_v62 }
 0x5cc   :  { %2362 = vmatprep.subr.bf16.mxu0 %v2510_v63 }
 0x5cf   :  { %2363 = vmatpush3.bf16.msra.mxu0 %v2510_v63 }
 0x672   :  { %v2342_v0 = vpop.f32.mrf.mxu0 }
 0x674   :  { %v1028_v1 = vpop.f32.mrf.mxu0 }
 0x676   :  { %v2343_v3 = vpop.f32.mrf.mxu0 }
 0x677   :  { %v1060_v5 = vpack.c.bf16 %v2343_v3, %v2342_v0 }
 0x678   :  { %v1031_v29 = vpop.f32.mrf.mxu0 }
 0x679   :  { %v1059_v4 = vpack.c.bf16 %v1031_v29, %v1028_v1  ;;  %v2511_v29 = vld [vmem:[%s3543_s12 + $0x38] sm:$0xff]  }
 0x67a   :  { %v2346_v6 = vpop.f32.mrf.mxu0  ;;  %2372 = vmatprep.subr.bf16.mxu1 %v2511_v29 }
 0x67b   :  { %2364 = vmatprep.mubr.bf16.mxu0 %v1059_v4  ;;  %2373 = vmatpush3.bf16.msra.mxu1 %v2511_v29 }
 0x67c   :  { %v1044_v7 = vpop.f32.mrf.mxu0  ;;  %2365 = vmatmul.mubr.bf16.vlgmr.msra.gmra.mxu0 %v1060_v5 }
 0x67e   :  { %v2347_v8 = vpop.f32.mrf.mxu0 }
 0x67f   :  { %v1062_v48 = vpack.c.bf16 %v2347_v8, %v2346_v6  ;;  %v2512_v6 = vld [vmem:[%s3543_s12 + $0x30] sm:$0xff]   ;;  %v2514_v8 = vld [vmem:[%s3543_s12 + $0x20] sm:$0xff]  }
 0x680   :  { %v1047_v9 = vpop.f32.mrf.mxu0  ;;  %2374 = vmatprep.subr.bf16.mxu1 %v2512_v6 }
 0x681   :  { %v1061_v11 = vpack.c.bf16 %v1047_v9, %v1044_v7  ;;  %2375 = vmatpush3.bf16.msra.mxu1 %v2512_v6  ;;  %v2513_v7 = vld [vmem:[%s3543_s12 + $0x28] sm:$0xff]   ;;  %v2515_v9 = vld [vmem:[%s3543_s12 + $0x18] sm:$0xff]  }
 0x682   :  { %2376 = vmatprep.subr.bf16.mxu1 %v2513_v7 }
 0x683   :  { %2368 = vmatprep.mubr.bf16.mxu0 %v1061_v11  ;;  %v2516_v11 = vld [vmem:[%s3543_s12 + $0x10] sm:$0xff]  }
 0x684   :  { %2369 = vmatmul.mubr.bf16.gmra.mxu0 %v1062_v48  ;;  %v2517_v48 = vld [vmem:[%s3543_s12 + $0x8] sm:$0xff]  }
 0x685   :  { %2377 = vmatpush3.bf16.msra.mxu1 %v2513_v7 }
 0x686   :  { %2378 = vmatprep.subr.bf16.mxu1 %v2514_v8 }
 0x689   :  { %2379 = vmatpush3.bf16.msra.mxu1 %v2514_v8 }
 0x68a   :  { %2380 = vmatprep.subr.bf16.mxu1 %v2515_v9 }
 0x68d   :  { %2381 = vmatpush3.bf16.msra.mxu1 %v2515_v9 }
 0x68e   :  { %2382 = vmatprep.subr.bf16.mxu1 %v2516_v11 }
 0x691   :  { %2383 = vmatpush3.bf16.msra.mxu1 %v2516_v11 }
 0x692   :  { %2384 = vmatprep.subr.bf16.mxu1 %v2517_v48 }
 0x695   :  { %2385 = vmatpush3.bf16.msra.mxu1 %v2517_v48 }
 0x73c   :  { %v2366_v12 = vpop.f32.mrf.mxu0 }
 0x73d   :  { %v1177_v19 = vadd.f32 %v2366_v12, %v2158_v14  ;;  %v2518_v12 = vld [vmem:[%s3543_s12] sm:$0xff]  }
 0x73e   :  { %v1168_v15 = vpop.f32.mrf.mxu0  ;;  %2386 = vmatprep.subr.bf16.mxu1 %v2518_v12 }
 0x73f   :  { %v1169_v38 = vadd.f32 %v2158_v14, %v1168_v15  ;;  %v3234_v25 = vadd.f32 %v1177_v19, %v3114_v10  ;;  %2387 = vmatpush3.bf16.msra.mxu1 %v2518_v12 }
 0x740   :  { %v2367_v17 = vpop.f32.mrf.mxu0 }
 0x741   :  { %v3230_v20 = vadd.f32 %v1169_v38, %v3116_v13  ;;  %v1180_v44 = vadd.f32 %v2367_v17, %v2158_v14 }
 0x742   :  { %v1171_v21 = vpop.f32.mrf.mxu0 }
 0x743   :  { %v1172_v22 = vadd.f32 %v2158_v14, %v1171_v21  ;;  %1209 = vadd.xlane.f32.xlu0 %v3230_v20  ;;  %v3242_v46 = vadd.f32 %v1180_v44, %v3119_v16 }
 0x744   :  { %v2370_v24 = vpop.f32.mrf.mxu0 }
 0x745   :  { %v3237_v40 = vadd.f32 %v1172_v22, %v3122_v18  ;;  %v1193_v32 = vadd.f32 %v2370_v24, %v2158_v14 }
 0x746   :  { %v1184_v27 = vpop.f32.mrf.mxu0 }
 0x747   :  { %v1185_v31 = vadd.f32 %v2158_v14, %v1184_v27  ;;  %1211 = vadd.xlane.f32.xlu1 %v3237_v40  ;;  %1213 = vadd.xlane.f32.xlu0 %v3234_v25  ;;  %v3250_v18 = vadd.f32 %v1193_v32, %v3128_v26 }
 0x748   :  { %v2371_v13 = vpop.f32.mrf.mxu0 }
 0x749   :  { %v3245_v33 = vadd.f32 %v1185_v31, %v3126_v23  ;;  %v1196_v34 = vadd.f32 %v2371_v13, %v2158_v14 }
 0x74a   :  { %v1187_v10 = vpop.f32.mrf.mxu0 }
 0x74b   :  { %v1188_v50 = vadd.f32 %v2158_v14, %v1187_v10  ;;  %1215 = vadd.xlane.f32.xlu1 %v3242_v46  ;;  %1217 = vadd.xlane.f32.xlu0 %v3245_v33  ;;  %v3258_v16 = vadd.f32 %v1196_v34, %v3135_v30 }
 0x74d   :  { %v3253_v35 = vadd.f32 %v1188_v50, %v3131_v28 }
 0x74f   :  { %1219 = vadd.xlane.f32.xlu1 %v3253_v35  ;;  %1221 = vadd.xlane.f32.xlu0 %v3250_v18 }
 0x753   :  { %1223 = vadd.xlane.f32.xlu1 %v3258_v16 }
 0x7cc   :  { %v1210_v23 = vpop.xlane.xlu0 %1209 }
 0x7cd   :  { %v1225_v36 = vmul.f32 0.0078125, %v1210_v23 }
 0x7cf   :  { %v3262_v37 = vsub.f32 %v3230_v20, %v1225_v36 }
 0x7d0   :  { %v1212_v26 = vpop.xlane.xlu1 %1211  ;;  %v1214_v39 = vpop.xlane.xlu0 %1213 }
 0x7d1   :  { %v1226_v41 = vmul.f32 0.0078125, %v1212_v26  ;;  %v1227_v57 = vmul.f32 0.0078125, %v1214_v39  ;;  %v1241_v28 = vmul.f32 %v3262_v37, %v3262_v37 }
 0x7d3   :  { %v3267_v42 = vsub.f32 %v3237_v40, %v1226_v41  ;;  %v3270_v30 = vsub.f32 %v3234_v25, %v1227_v57  ;;  %1249 = vadd.xlane.f32.xlu0 %v1241_v28 }
 0x7d4   :  { %v1216_v58 = vpop.xlane.xlu1 %1215  ;;  %v1218_v43 = vpop.xlane.xlu0 %1217 }
 0x7d5   :  { %v1228_v45 = vmul.f32 0.0078125, %v1216_v58  ;;  %v1229_v47 = vmul.f32 0.0078125, %v1218_v43  ;;  %v1242_v2 = vmul.f32 %v3267_v42, %v3267_v42  ;;  %v1243_v51 = vmul.f32 %v3270_v30, %v3270_v30 }
 0x7d7   :  { %v3277_v52 = vsub.f32 %v3242_v46, %v1228_v45  ;;  %v3280_v53 = vsub.f32 %v3245_v33, %v1229_v47  ;;  %1251 = vadd.xlane.f32.xlu1 %v1242_v2  ;;  %1253 = vadd.xlane.f32.xlu0 %v1243_v51  ;;  %v2167_v47 = vld [vmem:[#allocation16] ss:$0 sm:$0xff] }
 0x7d8   :  { %v1220_v54 = vpop.xlane.xlu1 %1219  ;;  %v1222_v56 = vpop.xlane.xlu0 %1221 }
 0x7d9   :  { %v1230_v55 = vmul.f32 0.0078125, %v1220_v54  ;;  %v1231_v49 = vmul.f32 0.0078125, %v1222_v56  ;;  %v1244_v59 = vmul.f32 %v3277_v52, %v3277_v52  ;;  %v1245_v60 = vmul.f32 %v3280_v53, %v3280_v53 }
 0x7db   :  { %v3287_v61 = vsub.f32 %v3253_v35, %v1230_v55  ;;  %v3290_v62 = vsub.f32 %v3250_v18, %v1231_v49  ;;  %1255 = vadd.xlane.f32.xlu1 %v1244_v59  ;;  %1257 = vadd.xlane.f32.xlu0 %v1245_v60  ;;  %v2168_v49 = vld [vmem:[#allocation17] ss:$0 sm:$0xff] }
 0x7dc   :  { %v1224_v63 = vpop.xlane.xlu1 %1223 }
 0x7dd   :  { %v1232_v0 = vmul.f32 0.0078125, %v1224_v63  ;;  %v1246_v1 = vmul.f32 %v3287_v61, %v3287_v61  ;;  %v1247_v3 = vmul.f32 %v3290_v62, %v3290_v62 }
 0x7df   :  { %v3300_v4 = vsub.f32 %v3258_v16, %v1232_v0  ;;  %1259 = vadd.xlane.f32.xlu1 %v1246_v1  ;;  %1261 = vadd.xlane.f32.xlu0 %v1247_v3 }
 0x7e1   :  { %v1248_v5 = vmul.f32 %v3300_v4, %v3300_v4 }
 0x7e3   :  { %1263 = vadd.xlane.f32.xlu1 %v1248_v5 }
 0x85c   :  { %v1250_v14 = vpop.xlane.xlu0 %1249 }
 0x85d   :  { %v1265_v15 = vmul.f32 0.0078125, %v1250_v14 }
 0x85f   :  { %v1273_v38 = vadd.f32 1e-05, %v1265_v15 }
 0x860   :  { %v1252_v17 = vpop.xlane.xlu1 %1251  ;;  %v1254_v19 = vpop.xlane.xlu0 %1253 }
 0x861   :  { %2583 = vrsqrt.f32 %v1273_v38  ;;  %v1266_v21 = vmul.f32 0.0078125, %v1252_v17  ;;  %v1267_v22 = vmul.f32 0.0078125, %v1254_v19 }
 0x863   :  { %v1274_v24 = vadd.f32 1e-05, %v1266_v21  ;;  %v1275_v44 = vadd.f32 1e-05, %v1267_v22 }
 0x864   :  { %v1256_v27 = vpop.xlane.xlu1 %1255  ;;  %v1258_v31 = vpop.xlane.xlu0 %1257 }
 0x865   :  { %2585 = vrsqrt.f32 %v1274_v24  ;;  %v1268_v13 = vmul.f32 0.0078125, %v1256_v27  ;;  %v1269_v32 = vmul.f32 0.0078125, %v1258_v31  ;;  %v2521_v27 = vld [vmem:[#allocation19 + $0x28] sm:$0xff]   ;;  %v2522_v31 = vld [vmem:[#allocation19 + $0x20] sm:$0xff]  }
 0x866   :  { %2587 = vrsqrt.f32 %v1275_v44 }
 0x867   :  { %v1276_v10 = vadd.f32 1e-05, %v1268_v13  ;;  %v1277_v50 = vadd.f32 1e-05, %v1269_v32  ;;  %v2524_v13 = vld [vmem:[#allocation19 + $0x10] sm:$0xff]   ;;  %v2525_v32 = vld [vmem:[#allocation19 + $0x8] sm:$0xff]  }
 0x868   :  { %v1260_v34 = vpop.xlane.xlu1 %1259  ;;  %v1262_v23 = vpop.xlane.xlu0 %1261 }
 0x869   :  { %2589 = vrsqrt.f32 %v1276_v10  ;;  %v1270_v36 = vmul.f32 0.0078125, %v1260_v34  ;;  %v1271_v26 = vmul.f32 0.0078125, %v1262_v23  ;;  %v2526_v10 = vld [vmem:[#allocation19] sm:$0xff]  }
 0x86a   :  { %2591 = vrsqrt.f32 %v1277_v50  ;;  %v2169_v50 = vld [vmem:[%s3544_s13] ss:$0 sm:$0xff] }
 0x86b   :  { %v1278_v39 = vadd.f32 1e-05, %v1270_v36  ;;  %v1279_v41 = vadd.f32 1e-05, %v1271_v26 }
 0x86c   :  { %v1264_v57 = vpop.xlane.xlu1 %1263 }
 0x86d   :  { %2593 = vrsqrt.f32 %v1278_v39  ;;  %v1272_v28 = vmul.f32 0.0078125, %v1264_v57 }
 0x86e   :  { %v2584_v58 = vpop.eup %2583  ;;  %2595 = vrsqrt.f32 %v1279_v41 }
 0x86f   :  { %v1280_v43 = vadd.f32 1e-05, %v1272_v28  ;;  %v1289_v45 = vmul.f32 %v2584_v58, %v3262_v37 }
 0x871   :  { %2597 = vrsqrt.f32 %v1280_v43  ;;  %v1303_v56 = vmul.f32 %v2167_v47, %v1289_v45 }
 0x872   :  { %v2586_v2 = vpop.eup %2585 }
 0x873   :  { %v2588_v51 = vpop.eup %2587  ;;  %v1290_v54 = vmul.f32 %v2586_v2, %v3267_v42  ;;  %v1317_v1 = vadd.f32 %v2168_v49, %v1303_v56 }
 0x874   :  { %v1291_v55 = vmul.f32 %v2588_v51, %v3270_v30 }
 0x875   :  { %v1304_v59 = vmul.f32 %v2167_v47, %v1290_v54 }
 0x876   :  { %v2590_v60 = vpop.eup %2589  ;;  %v1305_v29 = vmul.f32 %v2167_v47, %v1291_v55 }
 0x877   :  { %v2592_v63 = vpop.eup %2591  ;;  %v1292_v0 = vmul.f32 %v2590_v60, %v3277_v52  ;;  %v1318_v3 = vadd.f32 %v2168_v49, %v1304_v59 }
 0x878   :  { %v1293_v37 = vmul.f32 %v2592_v63, %v3280_v53  ;;  %v1319_v42 = vadd.f32 %v2168_v49, %v1305_v29 }
 0x879   :  { %v1325_v5 = vpack.c.bf16 %v1318_v3, %v1317_v1  ;;  %v1306_v6 = vmul.f32 %v2167_v47, %v1292_v0 }
 0x87a   :  { %v2594_v7 = vpop.eup %2593  ;;  %v1307_v11 = vmul.f32 %v2167_v47, %v1293_v37 }
 0x87b   :  { %v2596_v8 = vpop.eup %2595  ;;  %2388 = vmatprep.mubr.bf16.mxu1 %v1325_v5  ;;  %v1320_v9 = vadd.f32 %v2168_v49, %v1306_v6  ;;  %v1294_v30 = vmul.f32 %v2594_v7, %v3287_v61  ;;  %v2519_v61 = vld [vmem:[#allocation19 + $0x38] sm:$0xff]  }
 0x87c   :  { %v1295_v48 = vmul.f32 %v2596_v8, %v3290_v62  ;;  %v1321_v15 = vadd.f32 %v2168_v49, %v1307_v11  ;;  %2396 = vmatprep.subr.bf16.mxu0 %v2519_v61  ;;  %v2520_v62 = vld [vmem:[#allocation19 + $0x30] sm:$0xff]  }
 0x87d   :  { %v1326_v12 = vpack.c.bf16 %v1320_v9, %v1319_v42  ;;  %v1308_v14 = vmul.f32 %v2167_v47, %v1294_v30  ;;  %2397 = vmatpush3.bf16.msra.mxu0 %v2519_v61 }
 0x87e   :  { %v2598_v52 = vpop.eup %2597  ;;  %v1309_v17 = vmul.f32 %v2167_v47, %v1295_v48  ;;  %2398 = vmatprep.subr.bf16.mxu0 %v2520_v62 }
 0x87f   :  { %2389 = vmatmul.mubr.bf16.vlgmr.msra.gmra.mxu1 %v1326_v12  ;;  %v1322_v38 = vadd.f32 %v2168_v49, %v1308_v14  ;;  %v1296_v53 = vmul.f32 %v2598_v52, %v3300_v4  ;;  %v2523_v4 = vld [vmem:[#allocation19 + $0x18] sm:$0xff]  }
 0x880   :  { %v1323_v22 = vadd.f32 %v2168_v49, %v1309_v17 }
 0x881   :  { %v1327_v19 = vpack.c.bf16 %v1322_v38, %v1321_v15  ;;  %v1310_v21 = vmul.f32 %v2167_v47, %v1296_v53  ;;  %2399 = vmatpush3.bf16.msra.mxu0 %v2520_v62 }
 0x882   :  { %2400 = vmatprep.subr.bf16.mxu0 %v2521_v27 }
 0x883   :  { %2392 = vmatprep.mubr.bf16.mxu1 %v1327_v19  ;;  %v1324_v24 = vadd.f32 %v2168_v49, %v1310_v21 }
 0x885   :  { %v1328_v44 = vpack.c.bf16 %v1324_v24, %v1323_v22  ;;  %2401 = vmatpush3.bf16.msra.mxu0 %v2521_v27 }
 0x886   :  { %2402 = vmatprep.subr.bf16.mxu0 %v2522_v31 }
 0x887   :  { %2393 = vmatmul.mubr.bf16.gmra.mxu1 %v1328_v44 }
 0x889   :  { %2403 = vmatpush3.bf16.msra.mxu0 %v2522_v31 }
 0x88a   :  { %2404 = vmatprep.subr.bf16.mxu0 %v2523_v4 }
 0x88d   :  { %2405 = vmatpush3.bf16.msra.mxu0 %v2523_v4 }
 0x88e   :  { %2406 = vmatprep.subr.bf16.mxu0 %v2524_v13 }
 0x891   :  { %2407 = vmatpush3.bf16.msra.mxu0 %v2524_v13 }
 0x892   :  { %2408 = vmatprep.subr.bf16.mxu0 %v2525_v32 }
 0x895   :  { %2409 = vmatpush3.bf16.msra.mxu0 %v2525_v32 }
 0x896   :  { %2410 = vmatprep.subr.bf16.mxu0 %v2526_v10 }
 0x899   :  { %2411 = vmatpush3.bf16.msra.mxu0 %v2526_v10 }
 0x93f   :  { %v2390_v34 = vpop.f32.mrf.mxu1 }
 0x940   :  { %v3336_v23 = vadd.f32 %v2390_v34, %v2169_v50 }
 0x941   :  { %v1434_v36 = vpop.f32.mrf.mxu1 }
 0x942   :  { %v3339_v26 = vmul.f32 0.70710677, %v3336_v23  ;;  %v3341_v39 = vadd.f32 %v2169_v50, %v1434_v36 }
 0x943   :  { %v2391_v41 = vpop.f32.mrf.mxu1 }
 0x944   :  { %v1483_v57 = vand.u32 2147483647, %v3339_v26  ;;  %v3345_v28 = vmul.f32 0.70710677, %v3341_v39  ;;  %v3347_v58 = vadd.f32 %v2391_v41, %v2169_v50  ;;  %vm1643_vm3 = vcmp.ge.f32.partialorder %v3339_v26, 0.0 }
 0x945   :  { %v1437_v43 = vpop.f32.mrf.mxu1 }
 0x946   :  { %v1491_v45 = vmul.f32 0.3275911, %v1483_v57  ;;  %v1481_v47 = vand.u32 2147483647, %v3345_v28  ;;  %v3351_v2 = vmul.f32 0.70710677, %v3347_v58  ;;  %v3353_v51 = vadd.f32 %v2169_v50, %v1437_v43 }
 0x947   :  { %v2394_v54 = vpop.f32.mrf.mxu1  ;;  %v1595_v8 = vsub.f32 0.0, %v1483_v57  ;;  %vm1641_vm4 = vcmp.ge.f32.partialorder %v3345_v28, 0.0 }
 0x948   :  { %v1499_v56 = vadd.f32 1.0, %v1491_v45  ;;  %v1489_v55 = vmul.f32 0.3275911, %v1481_v47  ;;  %v1484_v49 = vand.u32 2147483647, %v3351_v2  ;;  %v3360_v29 = vadd.f32 %v2394_v54, %v2169_v50 }
 0x949   :  { %v3357_v59 = vmul.f32 0.70710677, %v3353_v51  ;;  %v1450_v60 = vpop.f32.mrf.mxu1  ;;  %v1593_v48 = vsub.f32 0.0, %v1481_v47  ;;  %v1603_v15 = vmul.f32 %v1595_v8, %v1483_v57  ;;  %vm1644_vm5 = vcmp.ge.f32.partialorder %v3351_v2, 0.0 }
 0x94a   :  { %2599 = vrcp.f32 %v1499_v56  ;;  %v1497_v63 = vadd.f32 1.0, %v1489_v55  ;;  %v1492_v0 = vmul.f32 0.3275911, %v1484_v49  ;;  %v3362_v37 = vadd.f32 %v2169_v50, %v1450_v60 }
 0x94b   :  { %v1482_v1 = vand.u32 2147483647, %v3357_v59  ;;  %v2395_v3 = vpop.f32.mrf.mxu1  ;;  %v3365_v7 = vmul.f32 0.70710677, %v3360_v29  ;;  %v1601_v19 = vmul.f32 %v1593_v48, %v1481_v47  ;;  %v1596_v21 = vsub.f32 0.0, %v1484_v49 }
 0x94c   :  { %2601 = vrcp.f32 %v1497_v63  ;;  %v1500_v5 = vadd.f32 1.0, %v1492_v0  ;;  %v3369_v11 = vmul.f32 0.70710677, %v3362_v37  ;;  %v3371_v12 = vadd.f32 %v2395_v3, %v2169_v50 }
 0x94d   :  { %v1490_v6 = vmul.f32 0.3275911, %v1482_v1  ;;  %v1453_v9 = vpop.f32.mrf.mxu1  ;;  %v1487_v30 = vand.u32 2147483647, %v3365_v7  ;;  %v1613_v62 = vmul.f32 1.442695, %v1603_v15 }
 0x94e   :  { %2603 = vrcp.f32 %v1500_v5  ;;  %v3373_v52 = vadd.f32 %v2169_v50, %v1453_v9  ;;  %v1485_v38 = vand.u32 2147483647, %v3369_v11  ;;  %v3377_v53 = vmul.f32 0.70710677, %v3371_v12 }
 0x94f   :  { %v1498_v42 = vadd.f32 1.0, %v1490_v6  ;;  %v1495_v14 = vmul.f32 0.3275911, %v1487_v30  ;;  %v1594_v27 = vsub.f32 0.0, %v1482_v1  ;;  %v1609_v10 = vmul.f32 1.442695, %v1601_v19 }
 0x950   :  { %v1493_v22 = vmul.f32 0.3275911, %v1485_v38  ;;  %v1488_v24 = vand.u32 2147483647, %v3377_v53  ;;  %v3381_v44 = vmul.f32 0.70710677, %v3373_v52  ;;  %v1604_v50 = vmul.f32 %v1596_v21, %v1484_v49 }
 0x951   :  { %2605 = vrcp.f32 %v1498_v42  ;;  %v1503_v17 = vadd.f32 1.0, %v1495_v14  ;;  %v1599_v57 = vsub.f32 0.0, %v1487_v30  ;;  %v1602_v47 = vmul.f32 %v1594_v27, %v1482_v1 }
 0x952   :  { %v1501_v31 = vadd.f32 1.0, %v1493_v22  ;;  %v1496_v4 = vmul.f32 0.3275911, %v1488_v24  ;;  %v3387_v32 = vand.u32 2147483647, %v3381_v44  ;;  %v1597_v55 = vsub.f32 0.0, %v1485_v38 }
 0x953   :  { %2607 = vrcp.f32 %v1503_v17  ;;  %v1615_v0 = vmul.f32 1.442695, %v1604_v50  ;;  %v1607_v5 = vmul.f32 %v1599_v57, %v1487_v30  ;;  %v1611_v42 = vmul.f32 1.442695, %v1602_v47 }
 0x954   :  { %2609 = vrcp.f32 %v1501_v31  ;;  %v1504_v34 = vadd.f32 1.0, %v1496_v4  ;;  %v1494_v43 = vmul.f32 0.3275911, %v3387_v32  ;;  %v1600_v9 = vsub.f32 0.0, %v1488_v24 }
 0x955   :  { %2611 = vpow2.f32 %v1613_v62  ;;  %v1605_v15 = vmul.f32 %v1597_v55, %v1485_v38  ;;  %v1621_v30 = vmul.f32 1.442695, %v1607_v5  ;;  %v1598_v57 = vsub.f32 0.0, %v3387_v32 }
 0x956   :  { %2613 = vrcp.f32 %v1504_v34  ;;  %v1502_v60 = vadd.f32 1.0, %v1494_v43  ;;  %v1608_v4 = vmul.f32 %v1600_v9, %v1488_v24  ;;  %v1468_v2 = vmul.f32 0.5, %v3347_v58 }
 0x957   :  { %v3383_v61 = vpop.eup %2599  ;;  %2615 = vpow2.f32 %v1609_v10  ;;  %v1617_v50 = vmul.f32 1.442695, %v1605_v15  ;;  %vm1642_vm6 = vcmp.ge.f32.partialorder %v3357_v59, 0.0  ;;  %vm1645_vm7 = vcmp.ge.f32.partialorder %v3369_v11, 0.0 }
 0x958   :  { %v1523_v13 = vmul.f32 1.0614054, %v3383_v61  ;;  %2617 = vrcp.f32 %v1502_v60  ;;  %vm1648_vm8 = vcmp.ge.f32.partialorder %v3377_v53, 0.0  ;;  %vm1647_vm9 = vcmp.ge.f32.partialorder %v3365_v7, 0.0 }
 0x959   :  { %v3389_v36 = vpop.eup %2601  ;;  %2619 = vpow2.f32 %v1615_v0  ;;  %vm1646_vm10 = vcmp.ge.f32.partialorder %v3381_v44, 0.0  ;;  %v1470_v11 = vmul.f32 0.5, %v3373_v52  ;;  %v1471_v7 = vmul.f32 0.5, %v3360_v29 }
 0x95a   :  { %v1531_v41 = vadd.f32 -1.4531521, %v1523_v13  ;;  %v1521_v45 = vmul.f32 1.0614054, %v3389_v36  ;;  %2621 = vpow2.f32 %v1611_v42 }
 0x95b   :  { %v3393_v54 = vpop.eup %2603  ;;  %2623 = vpow2.f32 %v1621_v30 }
 0x95c   :  { %v1539_v56 = vmul.f32 %v3383_v61, %v1531_v41  ;;  %v1529_v49 = vadd.f32 -1.4531521, %v1521_v45  ;;  %v1524_v63 = vmul.f32 1.0614054, %v3393_v54  ;;  %2625 = vpow2.f32 %v1617_v50 }
 0x95e   :  { %v1547_v3 = vadd.f32 1.4214138, %v1539_v56  ;;  %v3397_v6 = vpop.eup %2605  ;;  %v1537_v8 = vmul.f32 %v3389_v36, %v1529_v49  ;;  %v1532_v1 = vadd.f32 -1.4531521, %v1524_v63  ;;  %v1623_v49 = vmul.f32 1.442695, %v1608_v4 }
 0x95f   :  { %v1522_v14 = vmul.f32 1.0614054, %v3397_v6 }
 0x960   :  { %v1555_v48 = vmul.f32 %v3383_v61, %v1547_v3  ;;  %v1545_v17 = vadd.f32 1.4214138, %v1537_v8  ;;  %v1540_v19 = vmul.f32 %v3393_v54, %v1532_v1  ;;  %v3403_v62 = vpop.eup %2607  ;;  %2627 = vpow2.f32 %v1623_v49 }
 0x961   :  { %v1530_v22 = vadd.f32 -1.4531521, %v1522_v14  ;;  %v1527_v38 = vmul.f32 1.0614054, %v3403_v62  ;;  %v3411_v43 = vpop.eup %2609 }
 0x962   :  { %v1563_v21 = vadd.f32 -0.28449672, %v1555_v48  ;;  %v1553_v27 = vmul.f32 %v3389_v36, %v1545_v17  ;;  %v1548_v31 = vadd.f32 1.4214138, %v1540_v19  ;;  %v1525_v60 = vmul.f32 1.0614054, %v3411_v43  ;;  %v2612_v63 = vpop.eup %2611 }
 0x963   :  { %v1538_v10 = vmul.f32 %v3397_v6, %v1530_v22  ;;  %v1535_v56 = vadd.f32 -1.4531521, %v1527_v38  ;;  %v3418_v8 = vpop.eup %2613  ;;  %v1606_v48 = vmul.f32 %v1598_v57, %v3387_v32 }
 0x964   :  { %v1571_v13 = vmul.f32 %v3383_v61, %v1563_v21  ;;  %v1561_v34 = vadd.f32 -0.28449672, %v1553_v27  ;;  %v1556_v41 = vmul.f32 %v3393_v54, %v1548_v31  ;;  %v1533_v9 = vadd.f32 -1.4531521, %v1525_v60  ;;  %v2616_v14 = vpop.eup %2615 }
 0x965   :  { %v1546_v47 = vadd.f32 1.4214138, %v1538_v10  ;;  %v1543_v5 = vmul.f32 %v3403_v62, %v1535_v56  ;;  %v1528_v21 = vmul.f32 1.0614054, %v3418_v8 }
 0x966   :  { %v1579_v45 = vadd.f32 0.2548296, %v1571_v13  ;;  %v1569_v24 = vmul.f32 %v3389_v36, %v1561_v34  ;;  %v1564_v55 = vadd.f32 -0.28449672, %v1556_v41  ;;  %v1541_v27 = vmul.f32 %v3411_v43, %v1533_v9 }
 0x967   :  { %v1554_v3 = vmul.f32 %v3397_v6, %v1546_v47  ;;  %v1551_v19 = vadd.f32 1.4214138, %v1543_v5  ;;  %v1536_v13 = vadd.f32 -1.4531521, %v1528_v21  ;;  %v1619_v47 = vmul.f32 1.442695, %v1606_v48 }
 0x968   :  { %v1587_v0 = vmul.f32 %v3383_v61, %v1579_v45  ;;  %v1577_v1 = vadd.f32 0.2548296, %v1569_v24  ;;  %v1572_v42 = vmul.f32 %v3393_v54, %v1564_v55  ;;  %v3423_v61 = vpop.eup %2617  ;;  %v1549_v50 = vadd.f32 1.4214138, %v1541_v27 }
 0x969   :  { %v1562_v17 = vadd.f32 -0.28449672, %v1554_v3  ;;  %v1559_v32 = vmul.f32 %v3403_v62, %v1551_v19  ;;  %v1526_v34 = vmul.f32 1.0614054, %v3423_v61  ;;  %v2620_v41 = vpop.eup %2619  ;;  %2629 = vpow2.f32 %v1619_v47 }
 0x96a   :  { %v1627_v15 = vmul.f32 %v2612_v63, %v1587_v0  ;;  %v1585_v22 = vmul.f32 %v3389_v36, %v1577_v1  ;;  %v1580_v30 = vadd.f32 0.2548296, %v1572_v42  ;;  %v1544_v36 = vmul.f32 %v3418_v8, %v1536_v13  ;;  %v2622_v49 = vpop.eup %2621 }
 0x96b   :  { %v1570_v4 = vmul.f32 %v3397_v6, %v1562_v17  ;;  %v1567_v45 = vadd.f32 -0.28449672, %v1559_v32  ;;  %v1557_v55 = vmul.f32 %v3411_v43, %v1549_v50  ;;  %v1534_v60 = vadd.f32 -1.4531521, %v1526_v34  ;;  %v2624_v17 = vpop.eup %2623 }
 0x96c   :  { %v1635_v31 = vsub.f32 1.0, %v1627_v15  ;;  %v1625_v10 = vmul.f32 %v2616_v14, %v1585_v22  ;;  %v1588_v38 = vmul.f32 %v3393_v54, %v1580_v30  ;;  %v1552_v3 = vadd.f32 1.4214138, %v1544_v36 }
 0x96d   :  { %v1578_v57 = vadd.f32 0.2548296, %v1570_v4  ;;  %v1575_v54 = vmul.f32 %v3403_v62, %v1567_v45  ;;  %v1565_v42 = vadd.f32 -0.28449672, %v1557_v55  ;;  %v1542_v15 = vmul.f32 %v3423_v61, %v1534_v60  ;;  %v2626_v4 = vpop.eup %2625 }
 0x96e   :  { %v1633_v56 = vsub.f32 1.0, %v1625_v10  ;;  %v1628_v24 = vmul.f32 %v2620_v41, %v1588_v38  ;;  %v1651_v63 = vsub.f32 0.0, %v1635_v31  ;;  %v1560_v48 = vmul.f32 %v3418_v8, %v1552_v3 }
 0x96f   :  { %v1586_v0 = vmul.f32 %v3397_v6, %v1578_v57  ;;  %v1583_v14 = vadd.f32 0.2548296, %v1575_v54  ;;  %v1573_v6 = vmul.f32 %v3411_v43, %v1565_v42  ;;  %v1550_v38 = vadd.f32 1.4214138, %v1542_v15  ;;  %v2628_v57 = vpop.eup %2627 }
 0x970   :  { %v1649_v5 = vsub.f32 0.0, %v1633_v56  ;;  %v1636_v1 = vsub.f32 1.0, %v1628_v24  ;;  %v1659_v21 = vsel %vm1643_vm3, %v1635_v31, %v1651_v63  ;;  %v1568_v27 = vadd.f32 -0.28449672, %v1560_v48 }
 0x971   :  { %v1626_v9 = vmul.f32 %v2622_v49, %v1586_v0  ;;  %v1591_v30 = vmul.f32 %v3403_v62, %v1583_v14  ;;  %v1581_v10 = vadd.f32 0.2548296, %v1573_v6  ;;  %v1466_v34 = vmul.f32 0.5, %v3353_v51 }
 0x972   :  { %v1652_v19 = vsub.f32 0.0, %v1636_v1  ;;  %v1657_v32 = vsel %vm1641_vm4, %v1633_v56, %v1649_v5  ;;  %v1576_v62 = vmul.f32 %v3418_v8, %v1568_v27  ;;  %v1558_v31 = vmul.f32 %v3423_v61, %v1550_v38 }
 0x973   :  { %v1634_v22 = vsub.f32 1.0, %v1626_v9  ;;  %v1589_v26 = vmul.f32 %v3411_v43, %v1581_v10  ;;  %v1667_v28 = vadd.f32 1.0, %v1659_v21  ;;  %v1665_v45 = vadd.f32 1.0, %v1657_v32 }
 0x974   :  { %v1660_v13 = vsel %vm1644_vm5, %v1636_v1, %v1652_v19  ;;  %v1631_v47 = vmul.f32 %v2624_v17, %v1591_v30  ;;  %v1584_v58 = vadd.f32 0.2548296, %v1576_v62  ;;  %v1566_v55 = vadd.f32 -0.28449672, %v1558_v31 }
 0x975   :  { %v1668_v50 = vadd.f32 1.0, %v1660_v13  ;;  %v1650_v41 = vsub.f32 0.0, %v1634_v22  ;;  %v1629_v24 = vmul.f32 %v2626_v4, %v1589_v26  ;;  %v1467_v51 = vmul.f32 0.5, %v3336_v23 }
 0x976   :  { %v1465_v60 = vmul.f32 0.5, %v3341_v39  ;;  %v1592_v63 = vmul.f32 %v3418_v8, %v1584_v58  ;;  %v1574_v0 = vmul.f32 %v3423_v61, %v1566_v55  ;;  %v1639_v3 = vsub.f32 1.0, %v1631_v47  ;;  %v2630_v17 = vpop.eup %2629 }
 0x977   :  { %v1658_v36 = vsel %vm1642_vm6, %v1634_v22, %v1650_v41  ;;  %v1676_v59 = vmul.f32 %v1668_v50, %v1468_v2  ;;  %v1637_v43 = vsub.f32 1.0, %v1629_v24  ;;  %v1675_v5 = vmul.f32 %v1667_v28, %v1467_v51 }
 0x978   :  { %v1666_v56 = vadd.f32 1.0, %v1658_v36  ;;  %v1673_v54 = vmul.f32 %v1665_v45, %v1465_v60  ;;  %v1632_v1 = vmul.f32 %v2628_v57, %v1592_v63  ;;  %v1582_v42 = vadd.f32 0.2548296, %v1574_v0 }
 0x979   :  { %v1682_v14 = vpack.c.bf16 %v1676_v59, %v1675_v5  ;;  %v1653_v48 = vsub.f32 0.0, %v1637_v43  ;;  %v1655_v39 = vsub.f32 0.0, %v1639_v3  ;;  %v1472_v13 = vmul.f32 0.5, %v3371_v12  ;;  %v2178_v12 = vld [vmem:[%s3546_s15] ss:$0 sm:$0xff] }
 0x97a   :  { %v1674_v49 = vmul.f32 %v1666_v56, %v1466_v34  ;;  %v1640_v15 = vsub.f32 1.0, %v1632_v1  ;;  %v1590_v23 = vmul.f32 %v3423_v61, %v1582_v42  ;;  %v1469_v38 = vmul.f32 0.5, %v3362_v37 }
 0x97b   :  { %v1661_v8 = vsel %vm1645_vm7, %v1637_v43, %v1653_v48  ;;  %v1663_v30 = vsel %vm1647_vm9, %v1639_v3, %v1655_v39 }
 0x97c   :  { %v1681_v9 = vpack.c.bf16 %v1674_v49, %v1673_v54  ;;  %v1656_v19 = vsub.f32 0.0, %v1640_v15  ;;  %v1630_v6 = vmul.f32 %v2630_v17, %v1590_v23  ;;  %v1669_v32 = vadd.f32 1.0, %v1661_v8 }
 0x97d   :  { %v1671_v61 = vadd.f32 1.0, %v1663_v30 }
 0x97e   :  { %2412 = vmatprep.mubr.bf16.mxu0 %v1681_v9  ;;  %v1664_v21 = vsel %vm1648_vm8, %v1640_v15, %v1656_v19  ;;  %v1638_v22 = vsub.f32 1.0, %v1630_v6  ;;  %v1677_v50 = vmul.f32 %v1669_v32, %v1469_v38 }
 0x97f   :  { %2413 = vmatmul.mubr.bf16.vlgmr.msra.gmra.mxu0 %v1682_v14  ;;  %v1672_v27 = vadd.f32 1.0, %v1664_v21  ;;  %v1679_v41 = vmul.f32 %v1671_v61, %v1471_v7  ;;  %v2527_v61 = vld [vmem:[#allocation20 + $0x38] sm:$0xff]  }
 0x980   :  { %v1654_v4 = vsub.f32 0.0, %v1638_v22  ;;  %2420 = vmatprep.subr.bf16.mxu1 %v2527_v61 }
 0x981   :  { %v1680_v2 = vmul.f32 %v1672_v27, %v1472_v13  ;;  %2421 = vmatpush3.bf16.msra.mxu1 %v2527_v61 }
 0x982   :  { %v1662_v10 = vsel %vm1646_vm10, %v1638_v22, %v1654_v4 }
 0x983   :  { %v1670_v53 = vadd.f32 1.0, %v1662_v10  ;;  %v1684_v62 = vpack.c.bf16 %v1680_v2, %v1679_v41  ;;  %v2528_v2 = vld [vmem:[#allocation20 + $0x30] sm:$0xff]   ;;  %v2531_v41 = vld [vmem:[#allocation20 + $0x18] sm:$0xff]  }
 0x984   :  { %2422 = vmatprep.subr.bf16.mxu1 %v2528_v2 }
 0x985   :  { %v1678_v34 = vmul.f32 %v1670_v53, %v1470_v11  ;;  %2423 = vmatpush3.bf16.msra.mxu1 %v2528_v2 }
 0x987   :  { %v1683_v26 = vpack.c.bf16 %v1678_v34, %v1677_v50  ;;  %v2529_v50 = vld [vmem:[#allocation20 + $0x28] sm:$0xff]   ;;  %v2530_v34 = vld [vmem:[#allocation20 + $0x20] sm:$0xff]  }
 0x988   :  { %2424 = vmatprep.subr.bf16.mxu1 %v2529_v50 }
 0x989   :  { %2416 = vmatprep.mubr.bf16.mxu0 %v1683_v26  ;;  %2425 = vmatpush3.bf16.msra.mxu1 %v2529_v50  ;;  %v2532_v26 = vld [vmem:[#allocation20 + $0x10] sm:$0xff]  }
 0x98a   :  { %2417 = vmatmul.mubr.bf16.gmra.mxu0 %v1684_v62  ;;  %2426 = vmatprep.subr.bf16.mxu1 %v2530_v34  ;;  %v2533_v62 = vld [vmem:[#allocation20 + $0x8] sm:$0xff]  }
 0x98d   :  { %2427 = vmatpush3.bf16.msra.mxu1 %v2530_v34 }
 0x98e   :  { %2428 = vmatprep.subr.bf16.mxu1 %v2531_v41 }
 0x991   :  { %2429 = vmatpush3.bf16.msra.mxu1 %v2531_v41 }
 0x992   :  { %2430 = vmatprep.subr.bf16.mxu1 %v2532_v26 }
 0x995   :  { %2431 = vmatpush3.bf16.msra.mxu1 %v2532_v26 }
 0x996   :  { %2432 = vmatprep.subr.bf16.mxu1 %v2533_v62 }
 0x999   :  { %2433 = vmatpush3.bf16.msra.mxu1 %v2533_v62 }
 0xa3f   :  { %v2414_v44 = vpop.f32.mrf.mxu0 }
 0xa40   :  { %v1799_v52 = vadd.f32 %v2414_v44, %v2178_v12  ;;  %v2534_v44 = vld [vmem:[#allocation20] sm:$0xff]  }
 0xa41   :  { %v1790_v31 = vpop.f32.mrf.mxu0  ;;  %2434 = vmatprep.subr.bf16.mxu1 %v2534_v44 }
 0xa42   :  { %v1791_v37 = vadd.f32 %v2178_v12, %v1790_v31  ;;  %v1823_v56 = vadd.f32 %v1799_v52, %v3234_v25  ;;  %2435 = vmatpush3.bf16.msra.mxu1 %v2534_v44 }
 0xa43   :  { %v2415_v57 = vpop.f32.mrf.mxu0 }
 0xa44   :  { %v1821_v28 = vadd.f32 %v1791_v37, %v3230_v20  ;;  %v1802_v36 = vadd.f32 %v2415_v57, %v2178_v12 }
 0xa45   :  { %v1793_v29 = vpop.f32.mrf.mxu0 }
 0xa46   :  { %v1794_v45 = vadd.f32 %v2178_v12, %v1793_v29  ;;  %1831 = vadd.xlane.f32.xlu0 %v1821_v28  ;;  %v1824_v24 = vadd.f32 %v1802_v36, %v3242_v46 }
 0xa48   :  { %v1822_v47 = vadd.f32 %v1794_v45, %v3237_v40 }
 0xa4a   :  { %1833 = vadd.xlane.f32.xlu1 %v1822_v47  ;;  %1835 = vadd.xlane.f32.xlu0 %v1823_v56  ;;  %v2418_v58 = vpop.f32.mrf.mxu0 }
 0xa4b   :  { %v1815_v59 = vadd.f32 %v2418_v58, %v2178_v12 }
 0xa4c   :  { %v1806_v55 = vpop.f32.mrf.mxu0 }
 0xa4d   :  { %v1807_v51 = vadd.f32 %v2178_v12, %v1806_v55  ;;  %v1827_v25 = vadd.f32 %v1815_v59, %v3250_v18 }
 0xa4e   :  { %1837 = vadd.xlane.f32.xlu1 %v1824_v24  ;;  %v2419_v60 = vpop.f32.mrf.mxu0 }
 0xa4f   :  { %v1825_v20 = vadd.f32 %v1807_v51, %v3245_v33  ;;  %v1818_v63 = vadd.f32 %v2419_v60, %v2178_v12 }
 0xa50   :  { %v1809_v49 = vpop.f32.mrf.mxu0 }
 0xa51   :  { %v1810_v43 = vadd.f32 %v2178_v12, %v1809_v49  ;;  %1839 = vadd.xlane.f32.xlu0 %v1825_v20  ;;  %v1828_v46 = vadd.f32 %v1818_v63, %v3258_v16  ;;  %v2187_v63 = vld [vmem:[%s3547_s16] ss:$0 sm:$0xff] }
 0xa53   :  { %v1826_v40 = vadd.f32 %v1810_v43, %v3253_v35 }
 0xa55   :  { %1841 = vadd.xlane.f32.xlu1 %v1826_v40  ;;  %1843 = vadd.xlane.f32.xlu0 %v1827_v25 }
 0xa59   :  { %1845 = vadd.xlane.f32.xlu1 %v1828_v46 }
 0xacf   :  { %v1832_v0 = vpop.xlane.xlu0 %1831 }
 0xad0   :  { %v1847_v54 = vmul.f32 0.0078125, %v1832_v0 }
 0xad2   :  { %v3476_v3 = vsub.f32 %v1821_v28, %v1847_v54 }
 0xad3   :  { %v1834_v5 = vpop.xlane.xlu1 %1833  ;;  %v1836_v1 = vpop.xlane.xlu0 %1835 }
 0xad4   :  { %v1848_v33 = vmul.f32 0.0078125, %v1834_v5  ;;  %v1849_v42 = vmul.f32 0.0078125, %v1836_v1  ;;  %v1863_v9 = vmul.f32 %v3476_v3, %v3476_v3 }
 0xad6   :  { %v3480_v14 = vsub.f32 %v1822_v47, %v1848_v33  ;;  %v3482_v35 = vsub.f32 %v1823_v56, %v1849_v42  ;;  %1871 = vadd.xlane.f32.xlu0 %v1863_v9  ;;  %v2188_v42 = vld [vmem:[%s3548_s17] ss:$0 sm:$0xff] }
 0xad7   :  { %v1838_v18 = vpop.xlane.xlu1 %1837 }
 0xad8   :  { %v1850_v48 = vmul.f32 0.0078125, %v1838_v18  ;;  %v1864_v16 = vmul.f32 %v3480_v14, %v3480_v14  ;;  %v1865_v15 = vmul.f32 %v3482_v35, %v3482_v35 }
 0xada   :  { %v3488_v23 = vsub.f32 %v1824_v24, %v1850_v48  ;;  %1873 = vadd.xlane.f32.xlu1 %v1864_v16  ;;  %1875 = vadd.xlane.f32.xlu0 %v1865_v15  ;;  %v1840_v39 = vpop.xlane.xlu0 %1839 }
 0xadb   :  { %v1851_v19 = vmul.f32 0.0078125, %v1840_v39 }
 0xadc   :  { %v1866_v17 = vmul.f32 %v3488_v23, %v3488_v23 }
 0xadd   :  { %v3492_v6 = vsub.f32 %v1825_v20, %v1851_v19 }
 0xade   :  { %1877 = vadd.xlane.f32.xlu1 %v1866_v17  ;;  %v1842_v8 = vpop.xlane.xlu1 %1841  ;;  %v1844_v21 = vpop.xlane.xlu0 %1843 }
 0xadf   :  { %v1852_v22 = vmul.f32 0.0078125, %v1842_v8  ;;  %v1853_v30 = vmul.f32 0.0078125, %v1844_v21  ;;  %v1867_v27 = vmul.f32 %v3492_v6, %v3492_v6 }
 0xae1   :  { %v3496_v4 = vsub.f32 %v1826_v40, %v1852_v22  ;;  %v3498_v32 = vsub.f32 %v1827_v25, %v1853_v30  ;;  %1879 = vadd.xlane.f32.xlu0 %v1867_v27 }
 0xae2   :  { %v1846_v13 = vpop.xlane.xlu1 %1845 }
 0xae3   :  { %v1854_v10 = vmul.f32 0.0078125, %v1846_v13  ;;  %v1868_v38 = vmul.f32 %v3496_v4, %v3496_v4  ;;  %v1869_v11 = vmul.f32 %v3498_v32, %v3498_v32 }
 0xae5   :  { %v3504_v53 = vsub.f32 %v1828_v46, %v1854_v10  ;;  %1881 = vadd.xlane.f32.xlu1 %v1868_v38  ;;  %1883 = vadd.xlane.f32.xlu0 %v1869_v11 }
 0xae7   :  { %v1870_v7 = vmul.f32 %v3504_v53, %v3504_v53 }
 0xae9   :  { %1885 = vadd.xlane.f32.xlu1 %v1870_v7 }
 0xb5f   :  { %v1872_v12 = vpop.xlane.xlu0 %1871 }
 0xb60   :  { %v1887_v31 = vmul.f32 0.0078125, %v1872_v12 }
 0xb62   :  { %v1895_v37 = vadd.f32 1e-05, %v1887_v31 }
 0xb63   :  { %v1874_v57 = vpop.xlane.xlu1 %1873  ;;  %v1876_v52 = vpop.xlane.xlu0 %1875 }
 0xb64   :  { %2631 = vrsqrt.f32 %v1895_v37  ;;  %v1888_v28 = vmul.f32 0.0078125, %v1874_v57  ;;  %v1889_v29 = vmul.f32 0.0078125, %v1876_v52 }
 0xb66   :  { %v1896_v45 = vadd.f32 1e-05, %v1888_v28  ;;  %v1897_v36 = vadd.f32 1e-05, %v1889_v29 }
 0xb67   :  { %v1878_v47 = vpop.xlane.xlu1 %1877 }
 0xb68   :  { %2633 = vrsqrt.f32 %v1896_v45  ;;  %v1890_v56 = vmul.f32 0.0078125, %v1878_v47 }
 0xb69   :  { %2635 = vrsqrt.f32 %v1897_v36 }
 0xb6a   :  { %v1898_v24 = vadd.f32 1e-05, %v1890_v56  ;;  %v1880_v58 = vpop.xlane.xlu0 %1879 }
 0xb6b   :  { %v1891_v55 = vmul.f32 0.0078125, %v1880_v58 }
 0xb6c   :  { %2637 = vrsqrt.f32 %v1898_v24 }
 0xb6d   :  { %v1899_v51 = vadd.f32 1e-05, %v1891_v55 }
 0xb6e   :  { %v1882_v59 = vpop.xlane.xlu1 %1881  ;;  %v1884_v20 = vpop.xlane.xlu0 %1883 }
 0xb6f   :  { %2639 = vrsqrt.f32 %v1899_v51  ;;  %v1892_v49 = vmul.f32 0.0078125, %v1882_v59  ;;  %v1893_v43 = vmul.f32 0.0078125, %v1884_v20 }
 0xb71   :  { %v2632_v60 = vpop.eup %2631  ;;  %v1900_v25 = vadd.f32 1e-05, %v1892_v49  ;;  %v1901_v46 = vadd.f32 1e-05, %v1893_v43 }
 0xb72   :  { %v1911_v40 = vmul.f32 %v2632_v60, %v3476_v3  ;;  %v1886_v54 = vpop.xlane.xlu1 %1885 }
 0xb73   :  { %2641 = vrsqrt.f32 %v1900_v25  ;;  %v1894_v33 = vmul.f32 0.0078125, %v1886_v54 }
 0xb74   :  { %v1925_v5 = vmul.f32 %v2187_v63, %v1911_v40  ;;  %2643 = vrsqrt.f32 %v1901_v46 }
 0xb75   :  { %v2634_v0 = vpop.eup %2633  ;;  %v1902_v48 = vadd.f32 1e-05, %v1894_v33 }
 0xb76   :  { %v2636_v1 = vpop.eup %2635  ;;  %v1912_v9 = vmul.f32 %v2634_v0, %v3480_v14  ;;  %v1939_v15 = vadd.f32 %v2188_v42, %v1925_v5 }
 0xb77   :  { %v1913_v18 = vmul.f32 %v2636_v1, %v3482_v35  ;;  %2645 = vrsqrt.f32 %v1902_v48 }
 0xb78   :  { %v1926_v16 = vmul.f32 %v2187_v63, %v1912_v9 }
 0xb79   :  { %v2638_v3 = vpop.eup %2637  ;;  %v1927_v19 = vmul.f32 %v2187_v63, %v1913_v18 }
 0xb7a   :  { %v1914_v17 = vmul.f32 %v2638_v3, %v3488_v23  ;;  %v1940_v39 = vadd.f32 %v2188_v42, %v1926_v16 }
 0xb7b   :  { %v1941_v22 = vadd.f32 %v2188_v42, %v1927_v19 }
 0xb7c   :  { %v1947_v8 = vpack.c.bf16 %v1940_v39, %v1939_v15  ;;  %v1928_v21 = vmul.f32 %v2187_v63, %v1914_v17  ;;  %v2640_v27 = vpop.eup %2639 }
 0xb7d   :  { %v1915_v14 = vmul.f32 %v2640_v27, %v3492_v6 }
 0xb7e   :  { %2436 = vmatprep.mubr.bf16.mxu1 %v1947_v8  ;;  %v1942_v30 = vadd.f32 %v2188_v42, %v1928_v21 }
 0xb7f   :  { %v1929_v38 = vmul.f32 %v2187_v63, %v1915_v14 }
 0xb80   :  { %v1948_v61 = vpack.c.bf16 %v1942_v30, %v1941_v22  ;;  %v2642_v35 = vpop.eup %2641 }
 0xb81   :  { %v2644_v13 = vpop.eup %2643  ;;  %v1916_v10 = vmul.f32 %v2642_v35, %v3496_v4  ;;  %v1943_v2 = vadd.f32 %v2188_v42, %v1929_v38  ;;  %v2189_v4 = vld [vmem:[%s3550_s19] ss:$0 sm:$0xff]  ;;  %s2100_s19 = sshll.u32 %s2942_s29, 4  ;;  %s2101_s19 = int_to_ptr.vmem [resolvable:$true] %s2100_s19 }
 0xb82   :  { %2437 = vmatmul.mubr.bf16.vlgmr.msra.gmra.mxu1 %v1948_v61  ;;  %v1917_v23 = vmul.f32 %v2644_v13, %v3498_v32  ;;  %s2887_s23 = scalar_lea.vmem %s2101_s19, 1024  ;;  %p2892_p5 = scmp.lt.s32.totalorder %s2101_s19, %s2101_s19 }
 0xb83   :  { %v1930_v11 = vmul.f32 %v2187_v63, %v1916_v10  ;;  %p2888_p4 = scmp.ne.s32.totalorder %s2101_s19, %s2887_s23  ;;  %p2893_p6 = scmp.lt.s32.totalorder %s2887_s23, %s2887_s23 }
 0xb84   :  { %v2646_v7 = vpop.eup %2645  ;;  %v1931_v41 = vmul.f32 %v2187_v63, %v1917_v23 }
 0xb85   :  { %v1944_v50 = vadd.f32 %v2188_v42, %v1930_v11  ;;  %v1918_v34 = vmul.f32 %v2646_v7, %v3504_v53  ;;  %p2894_p7 = por %p2893_p6, %p2892_p5 }
 0xb86   :  { %v1945_v44 = vadd.f32 %v2188_v42, %v1931_v41 }
 0xb87   :  { %v1949_v26 = vpack.c.bf16 %v1944_v50, %v1943_v2  ;;  %v1932_v62 = vmul.f32 %v2187_v63, %v1918_v34  ;;  %p2895_p8 = pnand %p2894_p7, %p2888_p4 }
 0xb89   :  { %2440 = vmatprep.mubr.bf16.mxu1 %v1949_v26  ;;  %v1946_v6 = vadd.f32 %v2188_v42, %v1932_v62 }
 0xb8b   :  { %v1950_v12 = vpack.c.bf16 %v1946_v6, %v1945_v44 }
 0xb8d   :  { %2441 = vmatmul.mubr.bf16.gmra.mxu1 %v1950_v12 }
 0xc42   :  { %v2438_v31 = vpop.f32.mrf.mxu1 }
 0xc43   :  { %v2065_v32 = vadd.f32 %v2438_v31, %v2189_v4 }
 0xc44   :  { %v2056_v37 = vpop.f32.mrf.mxu1 }
 0xc45   :  { %2089 = vst [vmem:[#allocation22 + $0x10] sm:$0xff] %v2065_v32  ;;  %v2057_v57 = vadd.f32 %v2189_v4, %v2056_v37 }
 0xc46   :  { %v2439_v52 = vpop.f32.mrf.mxu1 }
 0xc47   :  { %2087 = vst [vmem:[#allocation22] sm:$0xff] %v2057_v57  ;;  %v2068_v53 = vadd.f32 %v2439_v52, %v2189_v4 }
 0xc48   :  { %v2059_v28 = vpop.f32.mrf.mxu1 }
 0xc49   :  { %2090 = vst [vmem:[#allocation22 + $0x18] sm:$0xff] %v2068_v53  ;;  %v2060_v29 = vadd.f32 %v2189_v4, %v2059_v28 }
 0xc4b   :  { %2088 = vst [vmem:[#allocation22 + $0x8] sm:$0xff] %v2060_v29 }
 0xc4d   :  { %v2442_v45 = vpop.f32.mrf.mxu1 }
 0xc4e   :  { %v2081_v36 = vadd.f32 %v2442_v45, %v2189_v4 }
 0xc4f   :  { %v2072_v47 = vpop.f32.mrf.mxu1 }
 0xc50   :  { %2093 = vst [vmem:[#allocation22 + $0x30] sm:$0xff] %v2081_v36  ;;  %v2073_v56 = vadd.f32 %v2189_v4, %v2072_v47 }
 0xc51   :  { %v2443_v24 = vpop.f32.mrf.mxu1 }
 0xc52   :  { %2091 = vst [vmem:[#allocation22 + $0x20] sm:$0xff] %v2073_v56  ;;  %v2084_v58 = vadd.f32 %v2443_v24, %v2189_v4 }
 0xc53   :  { %v2075_v55 = vpop.f32.mrf.mxu1 }
 0xc54   :  { %2094 = vst [vmem:[#allocation22 + $0x38] sm:$0xff] %v2084_v58  ;;  %v2076_v51 = vadd.f32 %v2189_v4, %v2075_v55 }
 0xc56   :  { %2092 = vst [vmem:[#allocation22 + $0x28] sm:$0xff] %v2076_v51 }
 0xc57   :  { %2898 = shalt.err (!%p2895_p8)
}
 0xc58   :  { %2106 = dma.vmem_to_hbm [thread:$0]  %s2101_s19, 1024, %s3551_s20, [#allocation4], %s2924_s24, %s2924_s24, %s2925_s2  }
 0xc59   :  { %2921 = dma.done.wait [#allocation4], 1024  }
 0xc5a   :  { %2922 = vsyncadd [#allocation4], 4294966272 }
 0xc5b   :  { %2110 = vsyncpa [#allocation3], 1 }
 0xc5c   :  { %2111 = vsyncpa [#allocation6], 1 }
 0xc5d   :  { %2112 = vsyncpa [#allocation9], 1 }
 0xc5e   :  { %2113 = vsyncpa [#allocation12], 1 }
 0xc5f   :  { %2114 = vsyncpa [#allocation15], 1 }
 0xc60   :  { %2115 = vsyncpa [#allocation18], 1 }
 0xc61   :  { %2116 = vsyncpa [#allocation21], 1 }
 0xc62   :  { %2117 = vsyncpa [#allocation4], 1 }

</bundles_post_ra>
